<compile_context>
chip_gen: v7x
topology: tpu7x:2x2x1
jax: 0.10.0
libtpu: 0.0.40
codegen_flags: <defaults>
</compile_context>

<pallas_src>
import functools

import jax
import jax.numpy as jnp
from jax.experimental import pallas as pl
from jax.experimental.pallas import tpu as pltpu

HIDDEN = 32
FEATURE = 63
TEXT_DIM = 768


def skeleton_lstm_kernel(slab_g_ref, slab_f_ref, out_ref, *,
                         batch, hidden, feature, seq_len, offs_g, offs_f):
    B, H, F, T = batch, hidden, feature, seq_len
    G = 3 * H                                    # gate width, order [i | o | g]

    # ---- unpack the two slabs (static, 8-aligned row offsets) ---------------
    acc    = slab_g_ref[pl.ds(offs_g[0], B), :]   # (B, G) frame@w1f + const1
    w2     = slab_g_ref[pl.ds(offs_g[1], H), :]   # (H, G) cell2 input weights
    b2     = slab_g_ref[pl.ds(offs_g[2], 1), :]   # (1, G)
    w3     = slab_g_ref[pl.ds(offs_g[3], H), :]   # (H, G) cell3 input weights
    b3     = slab_g_ref[pl.ds(offs_g[4], 1), :]   # (1, G)
    w_fold = slab_g_ref[pl.ds(offs_g[5], H), :]   # (H, G) = w_out @ w1f
    b_fold = slab_g_ref[pl.ds(offs_g[6], 1), :]   # (1, G) = b_out @ w1f

    w_out  = slab_f_ref[pl.ds(offs_f[0], H), :]   # (H, F) lin2*lin3*lin4
    b_out  = slab_f_ref[pl.ds(offs_f[1], 1), :]   # (1, F)
    frame  = slab_f_ref[pl.ds(offs_f[2], B), :]   # (B, F) motions[:, 0, :]

    # ---- hoist bias broadcasts out of the unrolled loop ---------------------
    b2b = jnp.broadcast_to(b2, (B, G))
    b3b = jnp.broadcast_to(b3, (B, G))
    bfb = jnp.broadcast_to(b_fold, (B, G))
    bob = jnp.broadcast_to(b_out, (B, F))

    def act(gates):
        # gate columns ordered [i | o | g]; c0 == 0 so h = o * tanh(i * g).
        # One sigmoid over 2H lanes + two tanh => 3 EUP pushes per cell.
        so = jax.nn.sigmoid(gates[:, :2 * H])
        g = jnp.tanh(gates[:, 2 * H:])
        return so[:, H:] * jnp.tanh(so[:, :H] * g)

    # ---- recurrence: 3 dependent matmuls per step on the serial chain -------
    # T is a small static int -> full unroll gives the scheduler visibility.
    # TODO(synk): switch to lax.fori_loop(carry=acc) if T grows beyond ~dozens.
    hs = []
    for t in range(T):
        h = act(acc)                                                    # cell1
        h = act(jnp.dot(h, w2, preferred_element_type=jnp.float32) + b2b)
        h = act(jnp.dot(h, w3, preferred_element_type=jnp.float32) + b3b)
        hs.append(h)
        if t + 1 < T:   # last update is dead; skip it off the chain
            acc = acc + jnp.dot(h, w_fold,
                                preferred_element_type=jnp.float32) + bfb

    # ---- epilogue: output projection + residual cumsum + writeback ----------
    # The per-t matmuls are mutually independent (pipeline through the MXU)
    # and entirely off the recurrence critical path.
    for t in range(T):
        out_t = jnp.dot(hs[t], w_out, preferred_element_type=jnp.float32) + bob
        frame = frame + out_t                      # method == 'current_frame'
        out_ref[:, pl.ds(t, 1), :] = frame[:, None, :]


def _pack_rows(pieces):
    """Stack 2-D arrays (same #cols) into one slab; each piece starts at an
    8-row-aligned offset so in-kernel slices are sublane aligned."""
    ncols = pieces[0].shape[1]
    rows, offs, off = [], [], 0
    for p in pieces:
        offs.append(off)
        pad = (-p.shape[0]) % 8
        if pad:
            p = jnp.concatenate([p, jnp.zeros((pad, ncols), p.dtype)], axis=0)
        rows.append(p)
        off += p.shape[0]
    return jnp.concatenate(rows, axis=0), tuple(offs)


def skeleton_lstm_forward(motions, text_embedding, params, hidden=HIDDEN):
    B, T, F = motions.shape
    H = hidden
    half = H // 2
    G = 3 * H
    (lt_w, lt_b, l1_w, l1_b, c1_w, c1_b, c2_w, c2_b, c3_w, c3_b,
     l2_w, l2_b, l3_w, l3_b, l4_w, l4_b) = params

    # ----- exact affine folds (weight-only algebra, done once in XLA) --------
    def reorder(m):
        # PyTorch gate order [i | f | g | o] -> [i | o | g]; dead f-gate dropped.
        return jnp.concatenate([m[:, 0:H], m[:, 3 * H:4 * H], m[:, 2 * H:3 * H]],
                               axis=1)

    c1_wr, c1_br = reorder(c1_w), reorder(c1_b)
    c2_wr, c2_br = reorder(c2_w), reorder(c2_b)
    c3_wr, c3_br = reorder(c3_w), reorder(c3_b)

    text_enc = text_embedding @ lt_w + lt_b                     # (B, half)
    w1f = l1_w @ c1_wr[:half]                                   # (F, G)
    const1 = l1_b @ c1_wr[:half] + text_enc @ c1_wr[half:] + c1_br   # (B, G)

    w_out = l2_w @ l3_w @ l4_w                                  # (H, F)
    b_out = (l2_b @ l3_w + l3_b) @ l4_w + l4_b                  # (1, F)
    w_fold = w_out @ w1f                                        # (H, G)
    b_fold = b_out @ w1f                                        # (1, G)

    frame0 = motions[:, 0, :]         # only motions[:, 0, :] is read
    acc0 = frame0 @ w1f + const1      # (B, G): gate-1 pre-activation at t=0

    # ----- pack everything into 2 DMA slabs ----------------------------------
    slab_g, offs_g = _pack_rows([acc0, c2_wr, c2_br, c3_wr, c3_br,
                                 w_fold, b_fold])               # (_, G)
    slab_f, offs_f = _pack_rows([w_out, b_out, frame0])         # (_, F)

    def full(shape):
        return pl.BlockSpec(shape, lambda i, _n=len(shape): (0,) * _n)

    kernel = functools.partial(skeleton_lstm_kernel, batch=B, hidden=H,
                               feature=F, seq_len=T,
                               offs_g=offs_g, offs_f=offs_f)
    return pl.pallas_call(
        kernel,
        out_shape=jax.ShapeDtypeStruct((B, T, F), jnp.float32),
        grid_spec=pltpu.PrefetchScalarGridSpec(
            num_scalar_prefetch=0,
            grid=(1,),                                   # single invocation
            in_specs=[
                full(slab_g.shape),                      # gate-width slab
                full(slab_f.shape),                      # feature-width slab
            ],
            out_specs=full((B, T, F)),
        ),
        compiler_params=pltpu.CompilerParams(
            dimension_semantics=("arbitrary",)),         # serial recurrence
    )(slab_g, slab_f)


def init_params(key, hidden=HIDDEN, feature=FEATURE, text_dim=TEXT_DIM):
    """Deterministic PyTorch-style init (uniform +-1/sqrt(fan_in)); lin4 = 0."""
    half = hidden // 2
    ks = iter(jax.random.split(key, 32))

    def linear(in_dim, out_dim, zero=False):
        if zero:
            return (jnp.zeros((in_dim, out_dim), jnp.float32),
                    jnp.zeros((1, out_dim), jnp.float32))
        bound = in_dim ** -0.5
        w = jax.random.uniform(next(ks), (in_dim, out_dim), jnp.float32, -bound, bound)
        b = jax.random.uniform(next(ks), (1, out_dim), jnp.float32, -bound, bound)
        return w, b

    def lstm_cell(input_size, hidden_size):
        bound = hidden_size ** -0.5
        w_ih = jax.random.uniform(next(ks), (input_size, 4 * hidden_size),
                                  jnp.float32, -bound, bound)
        b_ih = jax.random.uniform(next(ks), (1, 4 * hidden_size),
                                  jnp.float32, -bound, bound)
        b_hh = jax.random.uniform(next(ks), (1, 4 * hidden_size),
                                  jnp.float32, -bound, bound)
        # h0 == c0 == 0 in every (stateless) call -> W_hh term vanishes;
        # fold b_ih + b_hh into one bias.
        return w_ih, b_ih + b_hh

    lt = linear(text_dim, half)
    l1 = linear(feature, half)
    c1 = lstm_cell(hidden, hidden)
    c2 = lstm_cell(hidden, hidden)
    c3 = lstm_cell(hidden, hidden)
    l2 = linear(hidden, hidden)
    l3 = linear(hidden, hidden)
    l4 = linear(hidden, feature, zero=True)  # nn.init.constant_(lin4, 0)
    return (*lt, *l1, *c1, *c2, *c3, *l2, *l3, *l4)


def reference_forward(motions, text_embedding, params, hidden=HIDDEN):
    """Pure-JAX reference mirroring the PyTorch forward (method='current_frame')."""
    (lt_w, lt_b, l1_w, l1_b, c1_w, c1_b, c2_w, c2_b, c3_w, c3_b,
     l2_w, l2_b, l3_w, l3_b, l4_w, l4_b) = params

    def cell(x, w, b):
        g = x @ w + b
        i = jax.nn.sigmoid(g[:, :hidden])
        gg = jnp.tanh(g[:, 2 * hidden:3 * hidden])
        o = jax.nn.sigmoid(g[:, 3 * hidden:])
        return o * jnp.tanh(i * gg)

    text_enc = text_embedding @ lt_w + lt_b
    frame = motions[:, 0, :]
    outs = []
    for _ in range(motions.shape[1]):
        me = frame @ l1_w + l1_b
        comb = jnp.concatenate([me, text_enc], axis=-1)
        h = cell(comb, c1_w, c1_b)
        h = cell(h, c2_w, c2_b)
        h = cell(h, c3_w, c3_b)
        out = ((h @ l2_w + l2_b) @ l3_w + l3_b) @ l4_w + l4_b
        frame = frame + out
        outs.append(frame)
    return jnp.stack(outs, axis=1)


if __name__ == "__main__":
    B, T, F, H = 2, 8, FEATURE, HIDDEN
    key = jax.random.PRNGKey(0)
    k_motion, k_text, k_params, k_w4, k_b4 = jax.random.split(key, 5)

    motions = jax.random.normal(k_motion, (B, T, F), jnp.float32)
    # TODO(synk): BertTokenizer/BertModel (frozen text encoder) has no Pallas
    # equivalent; its pooled output is replaced by a synthetic (B, 768) embedding.
    text_embedding = jax.random.normal(k_text, (B, TEXT_DIM), jnp.float32)
    params = init_params(k_params, H, F)

    out = skeleton_lstm_forward(motions, text_embedding, params)
    jax.block_until_ready(out)
    assert out.shape == (B, T, F)
    ref = reference_forward(motions, text_embedding, params)
    assert jnp.allclose(out, ref, atol=1e-4, rtol=1e-4)

    # Extra numerics check with a non-zero lin4 (the module inits it to zero,
    # which makes the residual recurrence trivial) to exercise the full path,
    # including the lin1->cell1, lin2*lin3*lin4 and w_out@w1f running-acc folds.
    params_nz = list(params)
    params_nz[14] = jax.random.uniform(k_w4, (H, F), jnp.float32, -0.1, 0.1)
    params_nz[15] = jax.random.uniform(k_b4, (1, F), jnp.float32, -0.1, 0.1)
    out_nz = skeleton_lstm_forward(motions, text_embedding, tuple(params_nz))
    ref_nz = reference_forward(motions, text_embedding, tuple(params_nz))
    jax.block_until_ready(out_nz)
    assert jnp.allclose(out_nz, ref_nz, atol=1e-4, rtol=1e-4)

    print("KERNEL_OK")
</pallas_src>

<mosaic_0001>
module attributes {stable_mosaic.version = 11 : i64} {
  func.func @skeleton_lstm_kernel(%arg0: i32, %arg1: memref<128x96xf32, #tpu.memory_space<vmem>>, %arg2: memref<48x63xf32, #tpu.memory_space<vmem>>, %arg3: memref<2x8x63xf32, #tpu.memory_space<vmem>>) attributes {dimension_semantics = [#tpu.dimension_semantics<arbitrary>], iteration_bounds = array<i64: 1>, scalar_prefetch = 0 : i64, scratch_operands = 0 : i64, tpu.core_type = #tpu.core_type<tc>, window_params = [{pipeline_mode = #tpu.pipeline_mode<synchronous>, transform_indices = @transform_0, window_bounds = array<i64: 128, 96>}, {pipeline_mode = #tpu.pipeline_mode<synchronous>, transform_indices = @transform_1, window_bounds = array<i64: 48, 63>}, {pipeline_mode = #tpu.pipeline_mode<synchronous>, transform_indices = @transform_2, window_bounds = array<i64: 2, 8, 63>}]} {
    %c0 = arith.constant 0 : index
    %c0_0 = arith.constant 0 : index
    %0 = vector.load %arg1[%c0, %c0_0] : memref<128x96xf32, #tpu.memory_space<vmem>>, vector<2x96xf32>
    %c8 = arith.constant 8 : index
    %c0_1 = arith.constant 0 : index
    %1 = vector.load %arg1[%c8, %c0_1] : memref<128x96xf32, #tpu.memory_space<vmem>>, vector<32x96xf32>
    %c40 = arith.constant 40 : index
    %c0_2 = arith.constant 0 : index
    %2 = vector.load %arg1[%c40, %c0_2] : memref<128x96xf32, #tpu.memory_space<vmem>>, vector<1x96xf32>
    %c48 = arith.constant 48 : index
    %c0_3 = arith.constant 0 : index
    %3 = vector.load %arg1[%c48, %c0_3] : memref<128x96xf32, #tpu.memory_space<vmem>>, vector<32x96xf32>
    %c80 = arith.constant 80 : index
    %c0_4 = arith.constant 0 : index
    %4 = vector.load %arg1[%c80, %c0_4] : memref<128x96xf32, #tpu.memory_space<vmem>>, vector<1x96xf32>
    %c88 = arith.constant 88 : index
    %c0_5 = arith.constant 0 : index
    %5 = vector.load %arg1[%c88, %c0_5] : memref<128x96xf32, #tpu.memory_space<vmem>>, vector<32x96xf32>
    %c120 = arith.constant 120 : index
    %c0_6 = arith.constant 0 : index
    %6 = vector.load %arg1[%c120, %c0_6] : memref<128x96xf32, #tpu.memory_space<vmem>>, vector<1x96xf32>
    %c0_7 = arith.constant 0 : index
    %c0_8 = arith.constant 0 : index
    %7 = vector.load %arg2[%c0_7, %c0_8] : memref<48x63xf32, #tpu.memory_space<vmem>>, vector<32x63xf32>
    %c32 = arith.constant 32 : index
    %c0_9 = arith.constant 0 : index
    %8 = vector.load %arg2[%c32, %c0_9] : memref<48x63xf32, #tpu.memory_space<vmem>>, vector<1x63xf32>
    %c40_10 = arith.constant 40 : index
    %c0_11 = arith.constant 0 : index
    %9 = vector.load %arg2[%c40_10, %c0_11] : memref<48x63xf32, #tpu.memory_space<vmem>>, vector<2x63xf32>
    %10 = vector.shape_cast %2 : vector<1x96xf32> to vector<1x96xf32>
    %11 = vector.broadcast %10 : vector<1x96xf32> to vector<2x96xf32>
    %12 = vector.shape_cast %4 : vector<1x96xf32> to vector<1x96xf32>
    %13 = vector.broadcast %12 : vector<1x96xf32> to vector<2x96xf32>
    %14 = vector.shape_cast %6 : vector<1x96xf32> to vector<1x96xf32>
    %15 = vector.broadcast %14 : vector<1x96xf32> to vector<2x96xf32>
    %16 = vector.shape_cast %8 : vector<1x63xf32> to vector<1x63xf32>
    %17 = vector.broadcast %16 : vector<1x63xf32> to vector<2x63xf32>
    %18 = vector.extract_strided_slice %0 {offsets = [0, 0], sizes = [2, 64], strides = [1, 1]} : vector<2x96xf32> to vector<2x64xf32>
    %19 = arith.negf %18 : vector<2x64xf32>
    %20 = math.exp %19 : vector<2x64xf32>
    %cst = arith.constant 1.000000e+00 : f32
    %21 = vector.broadcast %cst : f32 to vector<2x64xf32>
    %22 = arith.addf %21, %20 : vector<2x64xf32>
    %23 = arith.divf %21, %22 : vector<2x64xf32>
    %24 = vector.extract_strided_slice %0 {offsets = [0, 64], sizes = [2, 32], strides = [1, 1]} : vector<2x96xf32> to vector<2x32xf32>
    %25 = math.tanh %24 : vector<2x32xf32>
    %26 = vector.extract_strided_slice %23 {offsets = [0, 32], sizes = [2, 32], strides = [1, 1]} : vector<2x64xf32> to vector<2x32xf32>
    %27 = vector.extract_strided_slice %23 {offsets = [0, 0], sizes = [2, 32], strides = [1, 1]} : vector<2x64xf32> to vector<2x32xf32>
    %28 = arith.mulf %27, %25 : vector<2x32xf32>
    %29 = math.tanh %28 : vector<2x32xf32>
    %30 = arith.mulf %26, %29 : vector<2x32xf32>
    %cst_12 = arith.constant dense<0.000000e+00> : vector<2x96xf32>
    %31 = tpu.matmul %30, %1, %cst_12 {dimension_numbers = #tpu.dot_dimension_numbers<[1], [0], [0], [1], [0, 0, 1, 1], [], []>} : vector<2x32xf32>, vector<32x96xf32>, vector<2x96xf32> -> vector<2x96xf32>
    %32 = arith.addf %31, %11 : vector<2x96xf32>
    %33 = vector.extract_strided_slice %32 {offsets = [0, 0], sizes = [2, 64], strides = [1, 1]} : vector<2x96xf32> to vector<2x64xf32>
    %34 = arith.negf %33 : vector<2x64xf32>
    %35 = math.exp %34 : vector<2x64xf32>
    %cst_13 = arith.constant 1.000000e+00 : f32
    %36 = vector.broadcast %cst_13 : f32 to vector<2x64xf32>
    %37 = arith.addf %36, %35 : vector<2x64xf32>
    %38 = arith.divf %36, %37 : vector<2x64xf32>
    %39 = vector.extract_strided_slice %32 {offsets = [0, 64], sizes = [2, 32], strides = [1, 1]} : vector<2x96xf32> to vector<2x32xf32>
    %40 = math.tanh %39 : vector<2x32xf32>
    %41 = vector.extract_strided_slice %38 {offsets = [0, 32], sizes = [2, 32], strides = [1, 1]} : vector<2x64xf32> to vector<2x32xf32>
    %42 = vector.extract_strided_slice %38 {offsets = [0, 0], sizes = [2, 32], strides = [1, 1]} : vector<2x64xf32> to vector<2x32xf32>
    %43 = arith.mulf %42, %40 : vector<2x32xf32>
    %44 = math.tanh %43 : vector<2x32xf32>
    %45 = arith.mulf %41, %44 : vector<2x32xf32>
    %cst_14 = arith.constant dense<0.000000e+00> : vector<2x96xf32>
    %46 = tpu.matmul %45, %3, %cst_14 {dimension_numbers = #tpu.dot_dimension_numbers<[1], [0], [0], [1], [0, 0, 1, 1], [], []>} : vector<2x32xf32>, vector<32x96xf32>, vector<2x96xf32> -> vector<2x96xf32>
    %47 = arith.addf %46, %13 : vector<2x96xf32>
    %48 = vector.extract_strided_slice %47 {offsets = [0, 0], sizes = [2, 64], strides = [1, 1]} : vector<2x96xf32> to vector<2x64xf32>
    %49 = arith.negf %48 : vector<2x64xf32>
    %50 = math.exp %49 : vector<2x64xf32>
    %cst_15 = arith.constant 1.000000e+00 : f32
    %51 = vector.broadcast %cst_15 : f32 to vector<2x64xf32>
    %52 = arith.addf %51, %50 : vector<2x64xf32>
    %53 = arith.divf %51, %52 : vector<2x64xf32>
    %54 = vector.extract_strided_slice %47 {offsets = [0, 64], sizes = [2, 32], strides = [1, 1]} : vector<2x96xf32> to vector<2x32xf32>
    %55 = math.tanh %54 : vector<2x32xf32>
    %56 = vector.extract_strided_slice %53 {offsets = [0, 32], sizes = [2, 32], strides = [1, 1]} : vector<2x64xf32> to vector<2x32xf32>
    %57 = vector.extract_strided_slice %53 {offsets = [0, 0], sizes = [2, 32], strides = [1, 1]} : vector<2x64xf32> to vector<2x32xf32>
    %58 = arith.mulf %57, %55 : vector<2x32xf32>
    %59 = math.tanh %58 : vector<2x32xf32>
    %60 = arith.mulf %56, %59 : vector<2x32xf32>
    %cst_16 = arith.constant dense<0.000000e+00> : vector<2x96xf32>
    %61 = tpu.matmul %60, %5, %cst_16 {dimension_numbers = #tpu.dot_dimension_numbers<[1], [0], [0], [1], [0, 0, 1, 1], [], []>} : vector<2x32xf32>, vector<32x96xf32>, vector<2x96xf32> -> vector<2x96xf32>
    %62 = arith.addf %0, %61 : vector<2x96xf32>
    %63 = arith.addf %62, %15 : vector<2x96xf32>
    %64 = vector.extract_strided_slice %63 {offsets = [0, 0], sizes = [2, 64], strides = [1, 1]} : vector<2x96xf32> to vector<2x64xf32>
    %65 = arith.negf %64 : vector<2x64xf32>
    %66 = math.exp %65 : vector<2x64xf32>
    %cst_17 = arith.constant 1.000000e+00 : f32
    %67 = vector.broadcast %cst_17 : f32 to vector<2x64xf32>
    %68 = arith.addf %67, %66 : vector<2x64xf32>
    %69 = arith.divf %67, %68 : vector<2x64xf32>
    %70 = vector.extract_strided_slice %63 {offsets = [0, 64], sizes = [2, 32], strides = [1, 1]} : vector<2x96xf32> to vector<2x32xf32>
    %71 = math.tanh %70 : vector<2x32xf32>
    %72 = vector.extract_strided_slice %69 {offsets = [0, 32], sizes = [2, 32], strides = [1, 1]} : vector<2x64xf32> to vector<2x32xf32>
    %73 = vector.extract_strided_slice %69 {offsets = [0, 0], sizes = [2, 32], strides = [1, 1]} : vector<2x64xf32> to vector<2x32xf32>
    %74 = arith.mulf %73, %71 : vector<2x32xf32>
    %75 = math.tanh %74 : vector<2x32xf32>
    %76 = arith.mulf %72, %75 : vector<2x32xf32>
    %cst_18 = arith.constant dense<0.000000e+00> : vector<2x96xf32>
    %77 = tpu.matmul %76, %1, %cst_18 {dimension_numbers = #tpu.dot_dimension_numbers<[1], [0], [0], [1], [0, 0, 1, 1], [], []>} : vector<2x32xf32>, vector<32x96xf32>, vector<2x96xf32> -> vector<2x96xf32>
    %78 = arith.addf %77, %11 : vector<2x96xf32>
    %79 = vector.extract_strided_slice %78 {offsets = [0, 0], sizes = [2, 64], strides = [1, 1]} : vector<2x96xf32> to vector<2x64xf32>
    %80 = arith.negf %79 : vector<2x64xf32>
    %81 = math.exp %80 : vector<2x64xf32>
    %cst_19 = arith.constant 1.000000e+00 : f32
    %82 = vector.broadcast %cst_19 : f32 to vector<2x64xf32>
    %83 = arith.addf %82, %81 : vector<2x64xf32>
    %84 = arith.divf %82, %83 : vector<2x64xf32>
    %85 = vector.extract_strided_slice %78 {offsets = [0, 64], sizes = [2, 32], strides = [1, 1]} : vector<2x96xf32> to vector<2x32xf32>
    %86 = math.tanh %85 : vector<2x32xf32>
    %87 = vector.extract_strided_slice %84 {offsets = [0, 32], sizes = [2, 32], strides = [1, 1]} : vector<2x64xf32> to vector<2x32xf32>
    %88 = vector.extract_strided_slice %84 {offsets = [0, 0], sizes = [2, 32], strides = [1, 1]} : vector<2x64xf32> to vector<2x32xf32>
    %89 = arith.mulf %88, %86 : vector<2x32xf32>
    %90 = math.tanh %89 : vector<2x32xf32>
    %91 = arith.mulf %87, %90 : vector<2x32xf32>
    %cst_20 = arith.constant dense<0.000000e+00> : vector<2x96xf32>
    %92 = tpu.matmul %91, %3, %cst_20 {dimension_numbers = #tpu.dot_dimension_numbers<[1], [0], [0], [1], [0, 0, 1, 1], [], []>} : vector<2x32xf32>, vector<32x96xf32>, vector<2x96xf32> -> vector<2x96xf32>
    %93 = arith.addf %92, %13 : vector<2x96xf32>
    %94 = vector.extract_strided_slice %93 {offsets = [0, 0], sizes = [2, 64], strides = [1, 1]} : vector<2x96xf32> to vector<2x64xf32>
    %95 = arith.negf %94 : vector<2x64xf32>
    %96 = math.exp %95 : vector<2x64xf32>
    %cst_21 = arith.constant 1.000000e+00 : f32
    %97 = vector.broadcast %cst_21 : f32 to vector<2x64xf32>
    %98 = arith.addf %97, %96 : vector<2x64xf32>
    %99 = arith.divf %97, %98 : vector<2x64xf32>
    %100 = vector.extract_strided_slice %93 {offsets = [0, 64], sizes = [2, 32], strides = [1, 1]} : vector<2x96xf32> to vector<2x32xf32>
    %101 = math.tanh %100 : vector<2x32xf32>
    %102 = vector.extract_strided_slice %99 {offsets = [0, 32], sizes = [2, 32], strides = [1, 1]} : vector<2x64xf32> to vector<2x32xf32>
    %103 = vector.extract_strided_slice %99 {offsets = [0, 0], sizes = [2, 32], strides = [1, 1]} : vector<2x64xf32> to vector<2x32xf32>
    %104 = arith.mulf %103, %101 : vector<2x32xf32>
    %105 = math.tanh %104 : vector<2x32xf32>
    %106 = arith.mulf %102, %105 : vector<2x32xf32>
    %cst_22 = arith.constant dense<0.000000e+00> : vector<2x96xf32>
    %107 = tpu.matmul %106, %5, %cst_22 {dimension_numbers = #tpu.dot_dimension_numbers<[1], [0], [0], [1], [0, 0, 1, 1], [], []>} : vector<2x32xf32>, vector<32x96xf32>, vector<2x96xf32> -> vector<2x96xf32>
    %108 = arith.addf %63, %107 : vector<2x96xf32>
    %109 = arith.addf %108, %15 : vector<2x96xf32>
    %110 = vector.extract_strided_slice %109 {offsets = [0, 0], sizes = [2, 64], strides = [1, 1]} : vector<2x96xf32> to vector<2x64xf32>
    %111 = arith.negf %110 : vector<2x64xf32>
    %112 = math.exp %111 : vector<2x64xf32>
    %cst_23 = arith.constant 1.000000e+00 : f32
    %113 = vector.broadcast %cst_23 : f32 to vector<2x64xf32>
    %114 = arith.addf %113, %112 : vector<2x64xf32>
    %115 = arith.divf %113, %114 : vector<2x64xf32>
    %116 = vector.extract_strided_slice %109 {offsets = [0, 64], sizes = [2, 32], strides = [1, 1]} : vector<2x96xf32> to vector<2x32xf32>
    %117 = math.tanh %116 : vector<2x32xf32>
    %118 = vector.extract_strided_slice %115 {offsets = [0, 32], sizes = [2, 32], strides = [1, 1]} : vector<2x64xf32> to vector<2x32xf32>
    %119 = vector.extract_strided_slice %115 {offsets = [0, 0], sizes = [2, 32], strides = [1, 1]} : vector<2x64xf32> to vector<2x32xf32>
    %120 = arith.mulf %119, %117 : vector<2x32xf32>
    %121 = math.tanh %120 : vector<2x32xf32>
    %122 = arith.mulf %118, %121 : vector<2x32xf32>
    %cst_24 = arith.constant dense<0.000000e+00> : vector<2x96xf32>
    %123 = tpu.matmul %122, %1, %cst_24 {dimension_numbers = #tpu.dot_dimension_numbers<[1], [0], [0], [1], [0, 0, 1, 1], [], []>} : vector<2x32xf32>, vector<32x96xf32>, vector<2x96xf32> -> vector<2x96xf32>
    %124 = arith.addf %123, %11 : vector<2x96xf32>
    %125 = vector.extract_strided_slice %124 {offsets = [0, 0], sizes = [2, 64], strides = [1, 1]} : vector<2x96xf32> to vector<2x64xf32>
    %126 = arith.negf %125 : vector<2x64xf32>
    %127 = math.exp %126 : vector<2x64xf32>
    %cst_25 = arith.constant 1.000000e+00 : f32
    %128 = vector.broadcast %cst_25 : f32 to vector<2x64xf32>
    %129 = arith.addf %128, %127 : vector<2x64xf32>
    %130 = arith.divf %128, %129 : vector<2x64xf32>
    %131 = vector.extract_strided_slice %124 {offsets = [0, 64], sizes = [2, 32], strides = [1, 1]} : vector<2x96xf32> to vector<2x32xf32>
    %132 = math.tanh %131 : vector<2x32xf32>
    %133 = vector.extract_strided_slice %130 {offsets = [0, 32], sizes = [2, 32], strides = [1, 1]} : vector<2x64xf32> to vector<2x32xf32>
    %134 = vector.extract_strided_slice %130 {offsets = [0, 0], sizes = [2, 32], strides = [1, 1]} : vector<2x64xf32> to vector<2x32xf32>
    %135 = arith.mulf %134, %132 : vector<2x32xf32>
    %136 = math.tanh %135 : vector<2x32xf32>
    %137 = arith.mulf %133, %136 : vector<2x32xf32>
    %cst_26 = arith.constant dense<0.000000e+00> : vector<2x96xf32>
    %138 = tpu.matmul %137, %3, %cst_26 {dimension_numbers = #tpu.dot_dimension_numbers<[1], [0], [0], [1], [0, 0, 1, 1], [], []>} : vector<2x32xf32>, vector<32x96xf32>, vector<2x96xf32> -> vector<2x96xf32>
    %139 = arith.addf %138, %13 : vector<2x96xf32>
    %140 = vector.extract_strided_slice %139 {offsets = [0, 0], sizes = [2, 64], strides = [1, 1]} : vector<2x96xf32> to vector<2x64xf32>
    %141 = arith.negf %140 : vector<2x64xf32>
    %142 = math.exp %141 : vector<2x64xf32>
    %cst_27 = arith.constant 1.000000e+00 : f32
    %143 = vector.broadcast %cst_27 : f32 to vector<2x64xf32>
    %144 = arith.addf %143, %142 : vector<2x64xf32>
    %145 = arith.divf %143, %144 : vector<2x64xf32>
    %146 = vector.extract_strided_slice %139 {offsets = [0, 64], sizes = [2, 32], strides = [1, 1]} : vector<2x96xf32> to vector<2x32xf32>
    %147 = math.tanh %146 : vector<2x32xf32>
    %148 = vector.extract_strided_slice %145 {offsets = [0, 32], sizes = [2, 32], strides = [1, 1]} : vector<2x64xf32> to vector<2x32xf32>
    %149 = vector.extract_strided_slice %145 {offsets = [0, 0], sizes = [2, 32], strides = [1, 1]} : vector<2x64xf32> to vector<2x32xf32>
    %150 = arith.mulf %149, %147 : vector<2x32xf32>
    %151 = math.tanh %150 : vector<2x32xf32>
    %152 = arith.mulf %148, %151 : vector<2x32xf32>
    %cst_28 = arith.constant dense<0.000000e+00> : vector<2x96xf32>
    %153 = tpu.matmul %152, %5, %cst_28 {dimension_numbers = #tpu.dot_dimension_numbers<[1], [0], [0], [1], [0, 0, 1, 1], [], []>} : vector<2x32xf32>, vector<32x96xf32>, vector<2x96xf32> -> vector<2x96xf32>
    %154 = arith.addf %109, %153 : vector<2x96xf32>
    %155 = arith.addf %154, %15 : vector<2x96xf32>
    %156 = vector.extract_strided_slice %155 {offsets = [0, 0], sizes = [2, 64], strides = [1, 1]} : vector<2x96xf32> to vector<2x64xf32>
    %157 = arith.negf %156 : vector<2x64xf32>
    %158 = math.exp %157 : vector<2x64xf32>
    %cst_29 = arith.constant 1.000000e+00 : f32
    %159 = vector.broadcast %cst_29 : f32 to vector<2x64xf32>
    %160 = arith.addf %159, %158 : vector<2x64xf32>
    %161 = arith.divf %159, %160 : vector<2x64xf32>
    %162 = vector.extract_strided_slice %155 {offsets = [0, 64], sizes = [2, 32], strides = [1, 1]} : vector<2x96xf32> to vector<2x32xf32>
    %163 = math.tanh %162 : vector<2x32xf32>
    %164 = vector.extract_strided_slice %161 {offsets = [0, 32], sizes = [2, 32], strides = [1, 1]} : vector<2x64xf32> to vector<2x32xf32>
    %165 = vector.extract_strided_slice %161 {offsets = [0, 0], sizes = [2, 32], strides = [1, 1]} : vector<2x64xf32> to vector<2x32xf32>
    %166 = arith.mulf %165, %163 : vector<2x32xf32>
    %167 = math.tanh %166 : vector<2x32xf32>
    %168 = arith.mulf %164, %167 : vector<2x32xf32>
    %cst_30 = arith.constant dense<0.000000e+00> : vector<2x96xf32>
    %169 = tpu.matmul %168, %1, %cst_30 {dimension_numbers = #tpu.dot_dimension_numbers<[1], [0], [0], [1], [0, 0, 1, 1], [], []>} : vector<2x32xf32>, vector<32x96xf32>, vector<2x96xf32> -> vector<2x96xf32>
    %170 = arith.addf %169, %11 : vector<2x96xf32>
    %171 = vector.extract_strided_slice %170 {offsets = [0, 0], sizes = [2, 64], strides = [1, 1]} : vector<2x96xf32> to vector<2x64xf32>
    %172 = arith.negf %171 : vector<2x64xf32>
    %173 = math.exp %172 : vector<2x64xf32>
    %cst_31 = arith.constant 1.000000e+00 : f32
    %174 = vector.broadcast %cst_31 : f32 to vector<2x64xf32>
    %175 = arith.addf %174, %173 : vector<2x64xf32>
    %176 = arith.divf %174, %175 : vector<2x64xf32>
    %177 = vector.extract_strided_slice %170 {offsets = [0, 64], sizes = [2, 32], strides = [1, 1]} : vector<2x96xf32> to vector<2x32xf32>
    %178 = math.tanh %177 : vector<2x32xf32>
    %179 = vector.extract_strided_slice %176 {offsets = [0, 32], sizes = [2, 32], strides = [1, 1]} : vector<2x64xf32> to vector<2x32xf32>
    %180 = vector.extract_strided_slice %176 {offsets = [0, 0], sizes = [2, 32], strides = [1, 1]} : vector<2x64xf32> to vector<2x32xf32>
    %181 = arith.mulf %180, %178 : vector<2x32xf32>
    %182 = math.tanh %181 : vector<2x32xf32>
    %183 = arith.mulf %179, %182 : vector<2x32xf32>
    %cst_32 = arith.constant dense<0.000000e+00> : vector<2x96xf32>
    %184 = tpu.matmul %183, %3, %cst_32 {dimension_numbers = #tpu.dot_dimension_numbers<[1], [0], [0], [1], [0, 0, 1, 1], [], []>} : vector<2x32xf32>, vector<32x96xf32>, vector<2x96xf32> -> vector<2x96xf32>
    %185 = arith.addf %184, %13 : vector<2x96xf32>
    %186 = vector.extract_strided_slice %185 {offsets = [0, 0], sizes = [2, 64], strides = [1, 1]} : vector<2x96xf32> to vector<2x64xf32>
    %187 = arith.negf %186 : vector<2x64xf32>
    %188 = math.exp %187 : vector<2x64xf32>
    %cst_33 = arith.constant 1.000000e+00 : f32
    %189 = vector.broadcast %cst_33 : f32 to vector<2x64xf32>
    %190 = arith.addf %189, %188 : vector<2x64xf32>
    %191 = arith.divf %189, %190 : vector<2x64xf32>
    %192 = vector.extract_strided_slice %185 {offsets = [0, 64], sizes = [2, 32], strides = [1, 1]} : vector<2x96xf32> to vector<2x32xf32>
    %193 = math.tanh %192 : vector<2x32xf32>
    %194 = vector.extract_strided_slice %191 {offsets = [0, 32], sizes = [2, 32], strides = [1, 1]} : vector<2x64xf32> to vector<2x32xf32>
    %195 = vector.extract_strided_slice %191 {offsets = [0, 0], sizes = [2, 32], strides = [1, 1]} : vector<2x64xf32> to vector<2x32xf32>
    %196 = arith.mulf %195, %193 : vector<2x32xf32>
    %197 = math.tanh %196 : vector<2x32xf32>
    %198 = arith.mulf %194, %197 : vector<2x32xf32>
    %cst_34 = arith.constant dense<0.000000e+00> : vector<2x96xf32>
    %199 = tpu.matmul %198, %5, %cst_34 {dimension_numbers = #tpu.dot_dimension_numbers<[1], [0], [0], [1], [0, 0, 1, 1], [], []>} : vector<2x32xf32>, vector<32x96xf32>, vector<2x96xf32> -> vector<2x96xf32>
    %200 = arith.addf %155, %199 : vector<2x96xf32>
    %201 = arith.addf %200, %15 : vector<2x96xf32>
    %202 = vector.extract_strided_slice %201 {offsets = [0, 0], sizes = [2, 64], strides = [1, 1]} : vector<2x96xf32> to vector<2x64xf32>
    %203 = arith.negf %202 : vector<2x64xf32>
    %204 = math.exp %203 : vector<2x64xf32>
    %cst_35 = arith.constant 1.000000e+00 : f32
    %205 = vector.broadcast %cst_35 : f32 to vector<2x64xf32>
    %206 = arith.addf %205, %204 : vector<2x64xf32>
    %207 = arith.divf %205, %206 : vector<2x64xf32>
    %208 = vector.extract_strided_slice %201 {offsets = [0, 64], sizes = [2, 32], strides = [1, 1]} : vector<2x96xf32> to vector<2x32xf32>
    %209 = math.tanh %208 : vector<2x32xf32>
    %210 = vector.extract_strided_slice %207 {offsets = [0, 32], sizes = [2, 32], strides = [1, 1]} : vector<2x64xf32> to vector<2x32xf32>
    %211 = vector.extract_strided_slice %207 {offsets = [0, 0], sizes = [2, 32], strides = [1, 1]} : vector<2x64xf32> to vector<2x32xf32>
    %212 = arith.mulf %211, %209 : vector<2x32xf32>
    %213 = math.tanh %212 : vector<2x32xf32>
    %214 = arith.mulf %210, %213 : vector<2x32xf32>
    %cst_36 = arith.constant dense<0.000000e+00> : vector<2x96xf32>
    %215 = tpu.matmul %214, %1, %cst_36 {dimension_numbers = #tpu.dot_dimension_numbers<[1], [0], [0], [1], [0, 0, 1, 1], [], []>} : vector<2x32xf32>, vector<32x96xf32>, vector<2x96xf32> -> vector<2x96xf32>
    %216 = arith.addf %215, %11 : vector<2x96xf32>
    %217 = vector.extract_strided_slice %216 {offsets = [0, 0], sizes = [2, 64], strides = [1, 1]} : vector<2x96xf32> to vector<2x64xf32>
    %218 = arith.negf %217 : vector<2x64xf32>
    %219 = math.exp %218 : vector<2x64xf32>
    %cst_37 = arith.constant 1.000000e+00 : f32
    %220 = vector.broadcast %cst_37 : f32 to vector<2x64xf32>
    %221 = arith.addf %220, %219 : vector<2x64xf32>
    %222 = arith.divf %220, %221 : vector<2x64xf32>
    %223 = vector.extract_strided_slice %216 {offsets = [0, 64], sizes = [2, 32], strides = [1, 1]} : vector<2x96xf32> to vector<2x32xf32>
    %224 = math.tanh %223 : vector<2x32xf32>
    %225 = vector.extract_strided_slice %222 {offsets = [0, 32], sizes = [2, 32], strides = [1, 1]} : vector<2x64xf32> to vector<2x32xf32>
    %226 = vector.extract_strided_slice %222 {offsets = [0, 0], sizes = [2, 32], strides = [1, 1]} : vector<2x64xf32> to vector<2x32xf32>
    %227 = arith.mulf %226, %224 : vector<2x32xf32>
    %228 = math.tanh %227 : vector<2x32xf32>
    %229 = arith.mulf %225, %228 : vector<2x32xf32>
    %cst_38 = arith.constant dense<0.000000e+00> : vector<2x96xf32>
    %230 = tpu.matmul %229, %3, %cst_38 {dimension_numbers = #tpu.dot_dimension_numbers<[1], [0], [0], [1], [0, 0, 1, 1], [], []>} : vector<2x32xf32>, vector<32x96xf32>, vector<2x96xf32> -> vector<2x96xf32>
    %231 = arith.addf %230, %13 : vector<2x96xf32>
    %232 = vector.extract_strided_slice %231 {offsets = [0, 0], sizes = [2, 64], strides = [1, 1]} : vector<2x96xf32> to vector<2x64xf32>
    %233 = arith.negf %232 : vector<2x64xf32>
    %234 = math.exp %233 : vector<2x64xf32>
    %cst_39 = arith.constant 1.000000e+00 : f32
    %235 = vector.broadcast %cst_39 : f32 to vector<2x64xf32>
    %236 = arith.addf %235, %234 : vector<2x64xf32>
    %237 = arith.divf %235, %236 : vector<2x64xf32>
    %238 = vector.extract_strided_slice %231 {offsets = [0, 64], sizes = [2, 32], strides = [1, 1]} : vector<2x96xf32> to vector<2x32xf32>
    %239 = math.tanh %238 : vector<2x32xf32>
    %240 = vector.extract_strided_slice %237 {offsets = [0, 32], sizes = [2, 32], strides = [1, 1]} : vector<2x64xf32> to vector<2x32xf32>
    %241 = vector.extract_strided_slice %237 {offsets = [0, 0], sizes = [2, 32], strides = [1, 1]} : vector<2x64xf32> to vector<2x32xf32>
    %242 = arith.mulf %241, %239 : vector<2x32xf32>
    %243 = math.tanh %242 : vector<2x32xf32>
    %244 = arith.mulf %240, %243 : vector<2x32xf32>
    %cst_40 = arith.constant dense<0.000000e+00> : vector<2x96xf32>
    %245 = tpu.matmul %244, %5, %cst_40 {dimension_numbers = #tpu.dot_dimension_numbers<[1], [0], [0], [1], [0, 0, 1, 1], [], []>} : vector<2x32xf32>, vector<32x96xf32>, vector<2x96xf32> -> vector<2x96xf32>
    %246 = arith.addf %201, %245 : vector<2x96xf32>
    %247 = arith.addf %246, %15 : vector<2x96xf32>
    %248 = vector.extract_strided_slice %247 {offsets = [0, 0], sizes = [2, 64], strides = [1, 1]} : vector<2x96xf32> to vector<2x64xf32>
    %249 = arith.negf %248 : vector<2x64xf32>
    %250 = math.exp %249 : vector<2x64xf32>
    %cst_41 = arith.constant 1.000000e+00 : f32
    %251 = vector.broadcast %cst_41 : f32 to vector<2x64xf32>
    %252 = arith.addf %251, %250 : vector<2x64xf32>
    %253 = arith.divf %251, %252 : vector<2x64xf32>
    %254 = vector.extract_strided_slice %247 {offsets = [0, 64], sizes = [2, 32], strides = [1, 1]} : vector<2x96xf32> to vector<2x32xf32>
    %255 = math.tanh %254 : vector<2x32xf32>
    %256 = vector.extract_strided_slice %253 {offsets = [0, 32], sizes = [2, 32], strides = [1, 1]} : vector<2x64xf32> to vector<2x32xf32>
    %257 = vector.extract_strided_slice %253 {offsets = [0, 0], sizes = [2, 32], strides = [1, 1]} : vector<2x64xf32> to vector<2x32xf32>
    %258 = arith.mulf %257, %255 : vector<2x32xf32>
    %259 = math.tanh %258 : vector<2x32xf32>
    %260 = arith.mulf %256, %259 : vector<2x32xf32>
    %cst_42 = arith.constant dense<0.000000e+00> : vector<2x96xf32>
    %261 = tpu.matmul %260, %1, %cst_42 {dimension_numbers = #tpu.dot_dimension_numbers<[1], [0], [0], [1], [0, 0, 1, 1], [], []>} : vector<2x32xf32>, vector<32x96xf32>, vector<2x96xf32> -> vector<2x96xf32>
    %262 = arith.addf %261, %11 : vector<2x96xf32>
    %263 = vector.extract_strided_slice %262 {offsets = [0, 0], sizes = [2, 64], strides = [1, 1]} : vector<2x96xf32> to vector<2x64xf32>
    %264 = arith.negf %263 : vector<2x64xf32>
    %265 = math.exp %264 : vector<2x64xf32>
    %cst_43 = arith.constant 1.000000e+00 : f32
    %266 = vector.broadcast %cst_43 : f32 to vector<2x64xf32>
    %267 = arith.addf %266, %265 : vector<2x64xf32>
    %268 = arith.divf %266, %267 : vector<2x64xf32>
    %269 = vector.extract_strided_slice %262 {offsets = [0, 64], sizes = [2, 32], strides = [1, 1]} : vector<2x96xf32> to vector<2x32xf32>
    %270 = math.tanh %269 : vector<2x32xf32>
    %271 = vector.extract_strided_slice %268 {offsets = [0, 32], sizes = [2, 32], strides = [1, 1]} : vector<2x64xf32> to vector<2x32xf32>
    %272 = vector.extract_strided_slice %268 {offsets = [0, 0], sizes = [2, 32], strides = [1, 1]} : vector<2x64xf32> to vector<2x32xf32>
    %273 = arith.mulf %272, %270 : vector<2x32xf32>
    %274 = math.tanh %273 : vector<2x32xf32>
    %275 = arith.mulf %271, %274 : vector<2x32xf32>
    %cst_44 = arith.constant dense<0.000000e+00> : vector<2x96xf32>
    %276 = tpu.matmul %275, %3, %cst_44 {dimension_numbers = #tpu.dot_dimension_numbers<[1], [0], [0], [1], [0, 0, 1, 1], [], []>} : vector<2x32xf32>, vector<32x96xf32>, vector<2x96xf32> -> vector<2x96xf32>
    %277 = arith.addf %276, %13 : vector<2x96xf32>
    %278 = vector.extract_strided_slice %277 {offsets = [0, 0], sizes = [2, 64], strides = [1, 1]} : vector<2x96xf32> to vector<2x64xf32>
    %279 = arith.negf %278 : vector<2x64xf32>
    %280 = math.exp %279 : vector<2x64xf32>
    %cst_45 = arith.constant 1.000000e+00 : f32
    %281 = vector.broadcast %cst_45 : f32 to vector<2x64xf32>
    %282 = arith.addf %281, %280 : vector<2x64xf32>
    %283 = arith.divf %281, %282 : vector<2x64xf32>
    %284 = vector.extract_strided_slice %277 {offsets = [0, 64], sizes = [2, 32], strides = [1, 1]} : vector<2x96xf32> to vector<2x32xf32>
    %285 = math.tanh %284 : vector<2x32xf32>
    %286 = vector.extract_strided_slice %283 {offsets = [0, 32], sizes = [2, 32], strides = [1, 1]} : vector<2x64xf32> to vector<2x32xf32>
    %287 = vector.extract_strided_slice %283 {offsets = [0, 0], sizes = [2, 32], strides = [1, 1]} : vector<2x64xf32> to vector<2x32xf32>
    %288 = arith.mulf %287, %285 : vector<2x32xf32>
    %289 = math.tanh %288 : vector<2x32xf32>
    %290 = arith.mulf %286, %289 : vector<2x32xf32>
    %cst_46 = arith.constant dense<0.000000e+00> : vector<2x96xf32>
    %291 = tpu.matmul %290, %5, %cst_46 {dimension_numbers = #tpu.dot_dimension_numbers<[1], [0], [0], [1], [0, 0, 1, 1], [], []>} : vector<2x32xf32>, vector<32x96xf32>, vector<2x96xf32> -> vector<2x96xf32>
    %292 = arith.addf %247, %291 : vector<2x96xf32>
    %293 = arith.addf %292, %15 : vector<2x96xf32>
    %294 = vector.extract_strided_slice %293 {offsets = [0, 0], sizes = [2, 64], strides = [1, 1]} : vector<2x96xf32> to vector<2x64xf32>
    %295 = arith.negf %294 : vector<2x64xf32>
    %296 = math.exp %295 : vector<2x64xf32>
    %cst_47 = arith.constant 1.000000e+00 : f32
    %297 = vector.broadcast %cst_47 : f32 to vector<2x64xf32>
    %298 = arith.addf %297, %296 : vector<2x64xf32>
    %299 = arith.divf %297, %298 : vector<2x64xf32>
    %300 = vector.extract_strided_slice %293 {offsets = [0, 64], sizes = [2, 32], strides = [1, 1]} : vector<2x96xf32> to vector<2x32xf32>
    %301 = math.tanh %300 : vector<2x32xf32>
    %302 = vector.extract_strided_slice %299 {offsets = [0, 32], sizes = [2, 32], strides = [1, 1]} : vector<2x64xf32> to vector<2x32xf32>
    %303 = vector.extract_strided_slice %299 {offsets = [0, 0], sizes = [2, 32], strides = [1, 1]} : vector<2x64xf32> to vector<2x32xf32>
    %304 = arith.mulf %303, %301 : vector<2x32xf32>
    %305 = math.tanh %304 : vector<2x32xf32>
    %306 = arith.mulf %302, %305 : vector<2x32xf32>
    %cst_48 = arith.constant dense<0.000000e+00> : vector<2x96xf32>
    %307 = tpu.matmul %306, %1, %cst_48 {dimension_numbers = #tpu.dot_dimension_numbers<[1], [0], [0], [1], [0, 0, 1, 1], [], []>} : vector<2x32xf32>, vector<32x96xf32>, vector<2x96xf32> -> vector<2x96xf32>
    %308 = arith.addf %307, %11 : vector<2x96xf32>
    %309 = vector.extract_strided_slice %308 {offsets = [0, 0], sizes = [2, 64], strides = [1, 1]} : vector<2x96xf32> to vector<2x64xf32>
    %310 = arith.negf %309 : vector<2x64xf32>
    %311 = math.exp %310 : vector<2x64xf32>
    %cst_49 = arith.constant 1.000000e+00 : f32
    %312 = vector.broadcast %cst_49 : f32 to vector<2x64xf32>
    %313 = arith.addf %312, %311 : vector<2x64xf32>
    %314 = arith.divf %312, %313 : vector<2x64xf32>
    %315 = vector.extract_strided_slice %308 {offsets = [0, 64], sizes = [2, 32], strides = [1, 1]} : vector<2x96xf32> to vector<2x32xf32>
    %316 = math.tanh %315 : vector<2x32xf32>
    %317 = vector.extract_strided_slice %314 {offsets = [0, 32], sizes = [2, 32], strides = [1, 1]} : vector<2x64xf32> to vector<2x32xf32>
    %318 = vector.extract_strided_slice %314 {offsets = [0, 0], sizes = [2, 32], strides = [1, 1]} : vector<2x64xf32> to vector<2x32xf32>
    %319 = arith.mulf %318, %316 : vector<2x32xf32>
    %320 = math.tanh %319 : vector<2x32xf32>
    %321 = arith.mulf %317, %320 : vector<2x32xf32>
    %cst_50 = arith.constant dense<0.000000e+00> : vector<2x96xf32>
    %322 = tpu.matmul %321, %3, %cst_50 {dimension_numbers = #tpu.dot_dimension_numbers<[1], [0], [0], [1], [0, 0, 1, 1], [], []>} : vector<2x32xf32>, vector<32x96xf32>, vector<2x96xf32> -> vector<2x96xf32>
    %323 = arith.addf %322, %13 : vector<2x96xf32>
    %324 = vector.extract_strided_slice %323 {offsets = [0, 0], sizes = [2, 64], strides = [1, 1]} : vector<2x96xf32> to vector<2x64xf32>
    %325 = arith.negf %324 : vector<2x64xf32>
    %326 = math.exp %325 : vector<2x64xf32>
    %cst_51 = arith.constant 1.000000e+00 : f32
    %327 = vector.broadcast %cst_51 : f32 to vector<2x64xf32>
    %328 = arith.addf %327, %326 : vector<2x64xf32>
    %329 = arith.divf %327, %328 : vector<2x64xf32>
    %330 = vector.extract_strided_slice %323 {offsets = [0, 64], sizes = [2, 32], strides = [1, 1]} : vector<2x96xf32> to vector<2x32xf32>
    %331 = math.tanh %330 : vector<2x32xf32>
    %332 = vector.extract_strided_slice %329 {offsets = [0, 32], sizes = [2, 32], strides = [1, 1]} : vector<2x64xf32> to vector<2x32xf32>
    %333 = vector.extract_strided_slice %329 {offsets = [0, 0], sizes = [2, 32], strides = [1, 1]} : vector<2x64xf32> to vector<2x32xf32>
    %334 = arith.mulf %333, %331 : vector<2x32xf32>
    %335 = math.tanh %334 : vector<2x32xf32>
    %336 = arith.mulf %332, %335 : vector<2x32xf32>
    %cst_52 = arith.constant dense<0.000000e+00> : vector<2x96xf32>
    %337 = tpu.matmul %336, %5, %cst_52 {dimension_numbers = #tpu.dot_dimension_numbers<[1], [0], [0], [1], [0, 0, 1, 1], [], []>} : vector<2x32xf32>, vector<32x96xf32>, vector<2x96xf32> -> vector<2x96xf32>
    %338 = arith.addf %293, %337 : vector<2x96xf32>
    %339 = arith.addf %338, %15 : vector<2x96xf32>
    %340 = vector.extract_strided_slice %339 {offsets = [0, 0], sizes = [2, 64], strides = [1, 1]} : vector<2x96xf32> to vector<2x64xf32>
    %341 = arith.negf %340 : vector<2x64xf32>
    %342 = math.exp %341 : vector<2x64xf32>
    %cst_53 = arith.constant 1.000000e+00 : f32
    %343 = vector.broadcast %cst_53 : f32 to vector<2x64xf32>
    %344 = arith.addf %343, %342 : vector<2x64xf32>
    %345 = arith.divf %343, %344 : vector<2x64xf32>
    %346 = vector.extract_strided_slice %339 {offsets = [0, 64], sizes = [2, 32], strides = [1, 1]} : vector<2x96xf32> to vector<2x32xf32>
    %347 = math.tanh %346 : vector<2x32xf32>
    %348 = vector.extract_strided_slice %345 {offsets = [0, 32], sizes = [2, 32], strides = [1, 1]} : vector<2x64xf32> to vector<2x32xf32>
    %349 = vector.extract_strided_slice %345 {offsets = [0, 0], sizes = [2, 32], strides = [1, 1]} : vector<2x64xf32> to vector<2x32xf32>
    %350 = arith.mulf %349, %347 : vector<2x32xf32>
    %351 = math.tanh %350 : vector<2x32xf32>
    %352 = arith.mulf %348, %351 : vector<2x32xf32>
    %cst_54 = arith.constant dense<0.000000e+00> : vector<2x96xf32>
    %353 = tpu.matmul %352, %1, %cst_54 {dimension_numbers = #tpu.dot_dimension_numbers<[1], [0], [0], [1], [0, 0, 1, 1], [], []>} : vector<2x32xf32>, vector<32x96xf32>, vector<2x96xf32> -> vector<2x96xf32>
    %354 = arith.addf %353, %11 : vector<2x96xf32>
    %355 = vector.extract_strided_slice %354 {offsets = [0, 0], sizes = [2, 64], strides = [1, 1]} : vector<2x96xf32> to vector<2x64xf32>
    %356 = arith.negf %355 : vector<2x64xf32>
    %357 = math.exp %356 : vector<2x64xf32>
    %cst_55 = arith.constant 1.000000e+00 : f32
    %358 = vector.broadcast %cst_55 : f32 to vector<2x64xf32>
    %359 = arith.addf %358, %357 : vector<2x64xf32>
    %360 = arith.divf %358, %359 : vector<2x64xf32>
    %361 = vector.extract_strided_slice %354 {offsets = [0, 64], sizes = [2, 32], strides = [1, 1]} : vector<2x96xf32> to vector<2x32xf32>
    %362 = math.tanh %361 : vector<2x32xf32>
    %363 = vector.extract_strided_slice %360 {offsets = [0, 32], sizes = [2, 32], strides = [1, 1]} : vector<2x64xf32> to vector<2x32xf32>
    %364 = vector.extract_strided_slice %360 {offsets = [0, 0], sizes = [2, 32], strides = [1, 1]} : vector<2x64xf32> to vector<2x32xf32>
    %365 = arith.mulf %364, %362 : vector<2x32xf32>
    %366 = math.tanh %365 : vector<2x32xf32>
    %367 = arith.mulf %363, %366 : vector<2x32xf32>
    %cst_56 = arith.constant dense<0.000000e+00> : vector<2x96xf32>
    %368 = tpu.matmul %367, %3, %cst_56 {dimension_numbers = #tpu.dot_dimension_numbers<[1], [0], [0], [1], [0, 0, 1, 1], [], []>} : vector<2x32xf32>, vector<32x96xf32>, vector<2x96xf32> -> vector<2x96xf32>
    %369 = arith.addf %368, %13 : vector<2x96xf32>
    %370 = vector.extract_strided_slice %369 {offsets = [0, 0], sizes = [2, 64], strides = [1, 1]} : vector<2x96xf32> to vector<2x64xf32>
    %371 = arith.negf %370 : vector<2x64xf32>
    %372 = math.exp %371 : vector<2x64xf32>
    %cst_57 = arith.constant 1.000000e+00 : f32
    %373 = vector.broadcast %cst_57 : f32 to vector<2x64xf32>
    %374 = arith.addf %373, %372 : vector<2x64xf32>
    %375 = arith.divf %373, %374 : vector<2x64xf32>
    %376 = vector.extract_strided_slice %369 {offsets = [0, 64], sizes = [2, 32], strides = [1, 1]} : vector<2x96xf32> to vector<2x32xf32>
    %377 = math.tanh %376 : vector<2x32xf32>
    %378 = vector.extract_strided_slice %375 {offsets = [0, 32], sizes = [2, 32], strides = [1, 1]} : vector<2x64xf32> to vector<2x32xf32>
    %379 = vector.extract_strided_slice %375 {offsets = [0, 0], sizes = [2, 32], strides = [1, 1]} : vector<2x64xf32> to vector<2x32xf32>
    %380 = arith.mulf %379, %377 : vector<2x32xf32>
    %381 = math.tanh %380 : vector<2x32xf32>
    %382 = arith.mulf %378, %381 : vector<2x32xf32>
    %cst_58 = arith.constant dense<0.000000e+00> : vector<2x63xf32>
    %383 = tpu.matmul %60, %7, %cst_58 {dimension_numbers = #tpu.dot_dimension_numbers<[1], [0], [0], [1], [0, 0, 1, 1], [], []>} : vector<2x32xf32>, vector<32x63xf32>, vector<2x63xf32> -> vector<2x63xf32>
    %384 = arith.addf %383, %17 : vector<2x63xf32>
    %385 = arith.addf %9, %384 : vector<2x63xf32>
    %386 = vector.shape_cast %385 : vector<2x63xf32> to vector<2x1x63xf32>
    %c0_59 = arith.constant 0 : index
    %c0_60 = arith.constant 0 : index
    %c0_61 = arith.constant 0 : index
    %387 = vector.load %arg3[%c0_59, %c0_60, %c0_61] : memref<2x8x63xf32, #tpu.memory_space<vmem>>, vector<2x1x63xf32>
    tpu.vector_store %arg3[%c0_59, %c0_60, %c0_61], %386 {strides = array<i32>} : memref<2x8x63xf32, #tpu.memory_space<vmem>>, vector<2x1x63xf32>,
    %cst_62 = arith.constant dense<0.000000e+00> : vector<2x63xf32>
    %388 = tpu.matmul %106, %7, %cst_62 {dimension_numbers = #tpu.dot_dimension_numbers<[1], [0], [0], [1], [0, 0, 1, 1], [], []>} : vector<2x32xf32>, vector<32x63xf32>, vector<2x63xf32> -> vector<2x63xf32>
    %389 = arith.addf %388, %17 : vector<2x63xf32>
    %390 = arith.addf %385, %389 : vector<2x63xf32>
    %391 = vector.shape_cast %390 : vector<2x63xf32> to vector<2x1x63xf32>
    %c0_63 = arith.constant 0 : index
    %c1 = arith.constant 1 : index
    %c0_64 = arith.constant 0 : index
    %392 = vector.load %arg3[%c0_63, %c1, %c0_64] : memref<2x8x63xf32, #tpu.memory_space<vmem>>, vector<2x1x63xf32>
    tpu.vector_store %arg3[%c0_63, %c1, %c0_64], %391 {strides = array<i32>} : memref<2x8x63xf32, #tpu.memory_space<vmem>>, vector<2x1x63xf32>,
    %cst_65 = arith.constant dense<0.000000e+00> : vector<2x63xf32>
    %393 = tpu.matmul %152, %7, %cst_65 {dimension_numbers = #tpu.dot_dimension_numbers<[1], [0], [0], [1], [0, 0, 1, 1], [], []>} : vector<2x32xf32>, vector<32x63xf32>, vector<2x63xf32> -> vector<2x63xf32>
    %394 = arith.addf %393, %17 : vector<2x63xf32>
    %395 = arith.addf %390, %394 : vector<2x63xf32>
    %396 = vector.shape_cast %395 : vector<2x63xf32> to vector<2x1x63xf32>
    %c0_66 = arith.constant 0 : index
    %c2 = arith.constant 2 : index
    %c0_67 = arith.constant 0 : index
    %397 = vector.load %arg3[%c0_66, %c2, %c0_67] : memref<2x8x63xf32, #tpu.memory_space<vmem>>, vector<2x1x63xf32>
    tpu.vector_store %arg3[%c0_66, %c2, %c0_67], %396 {strides = array<i32>} : memref<2x8x63xf32, #tpu.memory_space<vmem>>, vector<2x1x63xf32>,
    %cst_68 = arith.constant dense<0.000000e+00> : vector<2x63xf32>
    %398 = tpu.matmul %198, %7, %cst_68 {dimension_numbers = #tpu.dot_dimension_numbers<[1], [0], [0], [1], [0, 0, 1, 1], [], []>} : vector<2x32xf32>, vector<32x63xf32>, vector<2x63xf32> -> vector<2x63xf32>
    %399 = arith.addf %398, %17 : vector<2x63xf32>
    %400 = arith.addf %395, %399 : vector<2x63xf32>
    %401 = vector.shape_cast %400 : vector<2x63xf32> to vector<2x1x63xf32>
    %c0_69 = arith.constant 0 : index
    %c3 = arith.constant 3 : index
    %c0_70 = arith.constant 0 : index
    %402 = vector.load %arg3[%c0_69, %c3, %c0_70] : memref<2x8x63xf32, #tpu.memory_space<vmem>>, vector<2x1x63xf32>
    tpu.vector_store %arg3[%c0_69, %c3, %c0_70], %401 {strides = array<i32>} : memref<2x8x63xf32, #tpu.memory_space<vmem>>, vector<2x1x63xf32>,
    %cst_71 = arith.constant dense<0.000000e+00> : vector<2x63xf32>
    %403 = tpu.matmul %244, %7, %cst_71 {dimension_numbers = #tpu.dot_dimension_numbers<[1], [0], [0], [1], [0, 0, 1, 1], [], []>} : vector<2x32xf32>, vector<32x63xf32>, vector<2x63xf32> -> vector<2x63xf32>
    %404 = arith.addf %403, %17 : vector<2x63xf32>
    %405 = arith.addf %400, %404 : vector<2x63xf32>
    %406 = vector.shape_cast %405 : vector<2x63xf32> to vector<2x1x63xf32>
    %c0_72 = arith.constant 0 : index
    %c4 = arith.constant 4 : index
    %c0_73 = arith.constant 0 : index
    %407 = vector.load %arg3[%c0_72, %c4, %c0_73] : memref<2x8x63xf32, #tpu.memory_space<vmem>>, vector<2x1x63xf32>
    tpu.vector_store %arg3[%c0_72, %c4, %c0_73], %406 {strides = array<i32>} : memref<2x8x63xf32, #tpu.memory_space<vmem>>, vector<2x1x63xf32>,
    %cst_74 = arith.constant dense<0.000000e+00> : vector<2x63xf32>
    %408 = tpu.matmul %290, %7, %cst_74 {dimension_numbers = #tpu.dot_dimension_numbers<[1], [0], [0], [1], [0, 0, 1, 1], [], []>} : vector<2x32xf32>, vector<32x63xf32>, vector<2x63xf32> -> vector<2x63xf32>
    %409 = arith.addf %408, %17 : vector<2x63xf32>
    %410 = arith.addf %405, %409 : vector<2x63xf32>
    %411 = vector.shape_cast %410 : vector<2x63xf32> to vector<2x1x63xf32>
    %c0_75 = arith.constant 0 : index
    %c5 = arith.constant 5 : index
    %c0_76 = arith.constant 0 : index
    %412 = vector.load %arg3[%c0_75, %c5, %c0_76] : memref<2x8x63xf32, #tpu.memory_space<vmem>>, vector<2x1x63xf32>
    tpu.vector_store %arg3[%c0_75, %c5, %c0_76], %411 {strides = array<i32>} : memref<2x8x63xf32, #tpu.memory_space<vmem>>, vector<2x1x63xf32>,
    %cst_77 = arith.constant dense<0.000000e+00> : vector<2x63xf32>
    %413 = tpu.matmul %336, %7, %cst_77 {dimension_numbers = #tpu.dot_dimension_numbers<[1], [0], [0], [1], [0, 0, 1, 1], [], []>} : vector<2x32xf32>, vector<32x63xf32>, vector<2x63xf32> -> vector<2x63xf32>
    %414 = arith.addf %413, %17 : vector<2x63xf32>
    %415 = arith.addf %410, %414 : vector<2x63xf32>
    %416 = vector.shape_cast %415 : vector<2x63xf32> to vector<2x1x63xf32>
    %c0_78 = arith.constant 0 : index
    %c6 = arith.constant 6 : index
    %c0_79 = arith.constant 0 : index
    %417 = vector.load %arg3[%c0_78, %c6, %c0_79] : memref<2x8x63xf32, #tpu.memory_space<vmem>>, vector<2x1x63xf32>
    tpu.vector_store %arg3[%c0_78, %c6, %c0_79], %416 {strides = array<i32>} : memref<2x8x63xf32, #tpu.memory_space<vmem>>, vector<2x1x63xf32>,
    %cst_80 = arith.constant dense<0.000000e+00> : vector<2x63xf32>
    %418 = tpu.matmul %382, %7, %cst_80 {dimension_numbers = #tpu.dot_dimension_numbers<[1], [0], [0], [1], [0, 0, 1, 1], [], []>} : vector<2x32xf32>, vector<32x63xf32>, vector<2x63xf32> -> vector<2x63xf32>
    %419 = arith.addf %418, %17 : vector<2x63xf32>
    %420 = arith.addf %415, %419 : vector<2x63xf32>
    %421 = vector.shape_cast %420 : vector<2x63xf32> to vector<2x1x63xf32>
    %c0_81 = arith.constant 0 : index
    %c7 = arith.constant 7 : index
    %c0_82 = arith.constant 0 : index
    %422 = vector.load %arg3[%c0_81, %c7, %c0_82] : memref<2x8x63xf32, #tpu.memory_space<vmem>>, vector<2x1x63xf32>
    tpu.vector_store %arg3[%c0_81, %c7, %c0_82], %421 {strides = array<i32>} : memref<2x8x63xf32, #tpu.memory_space<vmem>>, vector<2x1x63xf32>,
    return
  }
  func.func @transform_0(%arg0: i32) -> (i32, i32) {
    %c0_i32 = arith.constant 0 : i32
    %c0_i32_0 = arith.constant 0 : i32
    %c0_i32_1 = arith.constant 0 : i32
    return %c0_i32, %c0_i32_0 : i32, i32
  }
  func.func @transform_1(%arg0: i32) -> (i32, i32) {
    %c0_i32 = arith.constant 0 : i32
    %c0_i32_0 = arith.constant 0 : i32
    %c0_i32_1 = arith.constant 0 : i32
    return %c0_i32, %c0_i32_0 : i32, i32
  }
  func.func @transform_2(%arg0: i32) -> (i32, i32, i32) {
    %c0_i32 = arith.constant 0 : i32
    %c0_i32_0 = arith.constant 0 : i32
    %c0_i32_1 = arith.constant 0 : i32
    %c0_i32_2 = arith.constant 0 : i32
    return %c0_i32, %c0_i32_0, %c0_i32_1 : i32, i32, i32
  }
}

</mosaic_0001>

<bundles_post_ra>
// kernel: tpu_custom_call.1
= control target key start
LH: loop header
LB: loop body
LE: loop exit
PB: predicated region body
PF: predicated region fallthrough
CT: control target
= control target key end

     0   :  { %s4562_s0 = inlined_call_operand.vmem [shape: f32[128,96], index: 0, kind: input, shape index: {}]   ;;  %s4563_s1 = inlined_call_operand.vmem [shape: f32[48,63], index: 1, kind: input, shape index: {}]   ;;  %s4564_s2 = inlined_call_operand.hbm [shape: f32[2,8,63], index: 2, kind: output, shape index: {}]  }
   0x1   :  { %v4025_v0 = vld [vmem:[%s4562_s0] sm:$0x3] }
   0x2   :  { %7 = vsyncpa [#allocation3], 0  ;;  %3779 = vtanh.f32 %v4025_v0  ;;  %s3997_s11 = smov 64   ;;  %v3032_v2 = vmul.f32 -1.442695, %v4025_v0  ;;  %v13_v8 = vld [vmem:[%s4562_s0 + $0x8] sm:$0xff] }
   0x3   :  { %v14_v9 = vld [vmem:[%s4562_s0 + $0x10] sm:$0xff]  ;;  %v15_v10 = vld [vmem:[%s4562_s0 + $0x18] sm:$0xff]  ;;  %v3998_v11 = vmov 0.0|0.0   ;;  %v16_v13 = vld [vmem:[%s4562_s0 + $0x20] sm:$0xff]  ;;  %vm3999_vm0 = vmmov 0   ;;  %v4000_v14 = vmov 0.0  }
   0x4   :  { %3781 = vpow2.f32 %v3032_v2  ;;  %3583 = vmatprep.subr.bf16.mxu0 %v3998_v11  ;;  %v4040_v12 = vpack.c.bf16 %v14_v9, %v13_v8  ;;  %3250 = vmatprep.mubr.msk.f32.mxu0 %vm3999_vm0, %v4000_v14  ;;  %v4051_v15 = vpack.c.bf16 %v16_v13, %v15_v10  ;;  %s4001_s20 = smov 32   ;;  %s4002_s21 = smov 96   ;;  %vm71_vm1 = vcmask 261120   ;;  %v4064_v20 = vld [vmem:[%s4562_s0 + $0x28] ss:$0 sm:$0xff]  ;;  %v18_v31 = vld [vmem:[%s4562_s0 + $0x30] sm:$0xff] }
   0x5   :  { %3589 = vmatprep.subr.bf16.mxu1 %v3998_v11  ;;  %3261 = vmatprep.mubr.msk.f32.mxu1 %vm3999_vm0, %v4000_v14  ;;  %v19_v32 = vld [vmem:[%s4562_s0 + $0x38] sm:$0xff]  ;;  %v20_v33 = vld [vmem:[%s4562_s0 + $0x40] sm:$0xff]  ;;  %v21_v35 = vld [vmem:[%s4562_s0 + $0x48] sm:$0xff]  ;;  %vm2318_vm2 = vcmask 507904  }
   0x6   :  { %3585 = vmatpush3.bf16.msra.mxu0 %v4040_v12  ;;  %v4077_v34 = vpack.c.bf16 %v19_v32, %v18_v31  ;;  %v4083_v36 = vpack.c.bf16 %v21_v35, %v20_v33  ;;  %v4100_v41 = vld [vmem:[%s4562_s0 + $0x50] ss:$0 sm:$0xff]  ;;  %v23_v52 = vld [vmem:[%s4562_s0 + $0x58] sm:$0xff]  ;;  %v24_v53 = vld [vmem:[%s4562_s0 + $0x60] sm:$0xff] }
   0x7   :  { %3586 = vmatprep.subr.bf16.mxu0 %v3998_v11  ;;  %v25_v54 = vld [vmem:[%s4562_s0 + $0x68] sm:$0xff]  ;;  %v4113_v55 = vpack.c.bf16 %v24_v53, %v23_v52  ;;  %v26_v56 = vld [vmem:[%s4562_s0 + $0x70] sm:$0xff]  ;;  %v4139_v62 = vld [vmem:[%s4562_s0 + $0x78] ss:$0 sm:$0xff] }
   0x8   :  { %3591 = vmatpush3.bf16.msra.mxu1 %v4077_v34  ;;  %v4119_v57 = vpack.c.bf16 %v26_v56, %v25_v54 }
   0x9   :  { %3592 = vmatprep.subr.bf16.mxu1 %v3998_v11 }
   0xa   :  { %3588 = vmatpush3.bf16.msra.mxu0 %v4051_v15 }
   0xb   :  { %3595 = vmatprep.subr.bf16.mxu0 %v3998_v11 }
   0xc   :  { %v3780_v1 = vpop.eup %3779  ;;  %3594 = vmatpush3.bf16.msra.mxu1 %v4083_v36 }
   0xd   :  { %58 = vrot.lane.b32.xlu0 %v3780_v1, %s3997_s11  ;;  %3601 = vmatprep.subr.bf16.mxu1 %v3998_v11 }
   0xe   :  { %v3782_v3 = vpop.eup %3781 }
   0xf   :  { %v53_v4 = vadd.f32 1.0, %v3782_v3 }
  0x11   :  { %3783 = vrcp.f32 %v53_v4 }
  0x1b   :  { %v3784_v5 = vpop.eup %3783 }
  0x7f   :  { %v59_v6 = vpop.permute.xlu0 %58 }
  0x80   :  { %v61_v7 = vmul.f32 %v3784_v5, %v59_v6 }
  0x82   :  { %3785 = vtanh.f32 %v61_v7 }
  0x8c   :  { %v3786_v16 = vpop.eup %3785 }
  0x8d   :  { %64 = vrot.lane.b32.xlu0 %v3786_v16, %s4001_s20 }
  0xff   :  { %v65_v17 = vpop.permute.xlu0 %64 }
 0x100   :  { %v67_v18 = vmul.f32 %v3784_v5, %v65_v17 }
 0x102   :  { %69 = vrot.lane.b32.xlu1 %v67_v18, %s4002_s21 }
 0x174   :  { %v70_v19 = vpop.permute.xlu1 %69 }
 0x175   :  { %3251 = vmatmul.mubr.msk.f32.vlgmr.msra.gmra.mrb[0].mxu0 %vm71_vm1, %v70_v19 }
 0x176   :  { %3272 = vmatprep.mubr.msk.f32.mxu0 %vm3999_vm0, %v4000_v14  ;;  %3597 = vmatpush3.bf16.msra.mxu0 %v4113_v55 }
 0x177   :  { %3598 = vmatprep.subr.bf16.mxu0 %v3998_v11 }
 0x17a   :  { %3600 = vmatpush3.bf16.msra.mxu0 %v4119_v57 }
 0x17b   :  { %3607 = vmatprep.subr.bf16.mxu0 %v3998_v11 }
 0x248   :  { %v140_v21 = vpop.f32.mrb[0].mxu0 }
 0x249   :  { %v141_v22 = vadd.f32 %v4064_v20, %v140_v21  ;;  %v3252_v23 = vpop.f32.mrb[1].mxu0 }
 0x24b   :  { %3787 = vtanh.f32 %v141_v22  ;;  %v3034_v25 = vmul.f32 -1.442695, %v141_v22 }
 0x24d   :  { %3789 = vpow2.f32 %v3034_v25 }
 0x255   :  { %v3788_v24 = vpop.eup %3787 }
 0x256   :  { %152 = vrot.lane.b32.xlu1 %v3788_v24, %s3997_s11 }
 0x257   :  { %v3790_v26 = vpop.eup %3789 }
 0x258   :  { %v147_v27 = vadd.f32 1.0, %v3790_v26 }
 0x25a   :  { %3791 = vrcp.f32 %v147_v27 }
 0x264   :  { %v3792_v28 = vpop.eup %3791 }
 0x2c8   :  { %v153_v29 = vpop.permute.xlu1 %152 }
 0x2c9   :  { %v155_v30 = vmul.f32 %v3792_v28, %v153_v29 }
 0x2cb   :  { %3793 = vtanh.f32 %v155_v30 }
 0x2d5   :  { %v3794_v37 = vpop.eup %3793 }
 0x2d6   :  { %158 = vrot.lane.b32.xlu0 %v3794_v37, %s4001_s20 }
 0x348   :  { %v159_v38 = vpop.permute.xlu0 %158 }
 0x349   :  { %v161_v39 = vmul.f32 %v3792_v28, %v159_v38 }
 0x34b   :  { %163 = vrot.lane.b32.xlu1 %v161_v39, %s4002_s21 }
 0x3bd   :  { %v164_v40 = vpop.permute.xlu1 %163 }
 0x3be   :  { %3262 = vmatmul.mubr.msk.f32.vlgmr.msra.gmra.mrb[0].mxu1 %vm71_vm1, %v164_v40 }
 0x3bf   :  { %3603 = vmatpush3.bf16.msra.mxu1 %v4040_v12  ;;  %3283 = vmatprep.mubr.msk.f32.mxu1 %vm3999_vm0, %v4000_v14 }
 0x3c0   :  { %3604 = vmatprep.subr.bf16.mxu1 %v3998_v11 }
 0x3c3   :  { %3606 = vmatpush3.bf16.msra.mxu1 %v4051_v15 }
 0x3c4   :  { %3613 = vmatprep.subr.bf16.mxu1 %v3998_v11 }
 0x491   :  { %v233_v42 = vpop.f32.mrb[0].mxu1 }
 0x492   :  { %v234_v43 = vadd.f32 %v4100_v41, %v233_v42  ;;  %v3263_v44 = vpop.f32.mrb[1].mxu1 }
 0x494   :  { %3795 = vtanh.f32 %v234_v43  ;;  %v3036_v46 = vmul.f32 -1.442695, %v234_v43 }
 0x496   :  { %3797 = vpow2.f32 %v3036_v46 }
 0x49e   :  { %v3796_v45 = vpop.eup %3795 }
 0x49f   :  { %245 = vrot.lane.b32.xlu0 %v3796_v45, %s3997_s11 }
 0x4a0   :  { %v3798_v47 = vpop.eup %3797 }
 0x4a1   :  { %v240_v48 = vadd.f32 1.0, %v3798_v47 }
 0x4a3   :  { %3799 = vrcp.f32 %v240_v48 }
 0x4ad   :  { %v3800_v49 = vpop.eup %3799 }
 0x511   :  { %v246_v50 = vpop.permute.xlu0 %245 }
 0x512   :  { %v248_v51 = vmul.f32 %v3800_v49, %v246_v50 }
 0x514   :  { %3801 = vtanh.f32 %v248_v51 }
 0x51e   :  { %v3802_v58 = vpop.eup %3801 }
 0x51f   :  { %251 = vrot.lane.b32.xlu1 %v3802_v58, %s4001_s20 }
 0x591   :  { %v252_v59 = vpop.permute.xlu1 %251 }
 0x592   :  { %v254_v60 = vmul.f32 %v3800_v49, %v252_v59 }
 0x594   :  { %256 = vrot.lane.b32.xlu0 %v254_v60, %s4002_s21 }
 0x606   :  { %v4126_v61 = vpop.permute.xlu0 %256 }
 0x607   :  { %3273 = vmatmul.mubr.msk.f32.vlgmr.msra.gmra.mrb[2].mxu0 %vm71_vm1, %v4126_v61 }
 0x608   :  { %3609 = vmatpush3.bf16.msra.mxu0 %v4077_v34  ;;  %3294 = vmatprep.mubr.msk.f32.mxu0 %vm3999_vm0, %v4000_v14 }
 0x609   :  { %3610 = vmatprep.subr.bf16.mxu0 %v3998_v11 }
 0x60c   :  { %3612 = vmatpush3.bf16.msra.mxu0 %v4083_v36 }
 0x60d   :  { %3619 = vmatprep.subr.bf16.mxu0 %v3998_v11 }
 0x6da   :  { %v326_v63 = vpop.f32.mrb[2].mxu0 }
 0x6db   :  { %v330_v1 = vadd.f32 %v326_v63, %v4025_v0  ;;  %v3274_v2 = vpop.f32.mrb[3].mxu0 }
 0x6dd   :  { %v4143_v3 = vadd.f32 %v4139_v62, %v330_v1 }
 0x6df   :  { %3803 = vtanh.f32 %v4143_v3  ;;  %v3038_v5 = vmul.f32 -1.442695, %v4143_v3 }
 0x6e1   :  { %3805 = vpow2.f32 %v3038_v5 }
 0x6e9   :  { %v3804_v4 = vpop.eup %3803 }
 0x6ea   :  { %340 = vrot.lane.b32.xlu1 %v3804_v4, %s3997_s11 }
 0x6eb   :  { %v3806_v6 = vpop.eup %3805 }
 0x6ec   :  { %v335_v7 = vadd.f32 1.0, %v3806_v6 }
 0x6ee   :  { %3807 = vrcp.f32 %v335_v7 }
 0x6f8   :  { %v3808_v8 = vpop.eup %3807 }
 0x75c   :  { %v341_v9 = vpop.permute.xlu1 %340 }
 0x75d   :  { %v343_v10 = vmul.f32 %v3808_v8, %v341_v9 }
 0x75f   :  { %3809 = vtanh.f32 %v343_v10 }
 0x769   :  { %v3810_v0 = vpop.eup %3809 }
 0x76a   :  { %346 = vrot.lane.b32.xlu0 %v3810_v0, %s4001_s20 }
 0x7dc   :  { %v347_v13 = vpop.permute.xlu0 %346 }
 0x7dd   :  { %v349_v16 = vmul.f32 %v3808_v8, %v347_v13 }
 0x7df   :  { %351 = vrot.lane.b32.xlu1 %v349_v16, %s4002_s21 }
 0x851   :  { %v352_v17 = vpop.permute.xlu1 %351 }
 0x852   :  { %3284 = vmatmul.mubr.msk.f32.vlgmr.msra.gmra.mrb[2].mxu1 %vm71_vm1, %v352_v17 }
 0x853   :  { %3615 = vmatpush3.bf16.msra.mxu1 %v4113_v55  ;;  %3305 = vmatprep.mubr.msk.f32.mxu1 %vm3999_vm0, %v4000_v14 }
 0x854   :  { %3616 = vmatprep.subr.bf16.mxu1 %v3998_v11 }
 0x857   :  { %3618 = vmatpush3.bf16.msra.mxu1 %v4119_v57 }
 0x858   :  { %3625 = vmatprep.subr.bf16.mxu1 %v3998_v11 }
 0x925   :  { %v421_v18 = vpop.f32.mrb[2].mxu1 }
 0x926   :  { %v422_v19 = vadd.f32 %v4064_v20, %v421_v18  ;;  %v3285_v21 = vpop.f32.mrb[3].mxu1 }
 0x928   :  { %3811 = vtanh.f32 %v422_v19  ;;  %v3040_v23 = vmul.f32 -1.442695, %v422_v19 }
 0x92a   :  { %3813 = vpow2.f32 %v3040_v23 }
 0x932   :  { %v3812_v22 = vpop.eup %3811 }
 0x933   :  { %433 = vrot.lane.b32.xlu0 %v3812_v22, %s3997_s11 }
 0x934   :  { %v3814_v24 = vpop.eup %3813 }
 0x935   :  { %v428_v25 = vadd.f32 1.0, %v3814_v24 }
 0x937   :  { %3815 = vrcp.f32 %v428_v25 }
 0x941   :  { %v3816_v26 = vpop.eup %3815 }
 0x9a5   :  { %v434_v27 = vpop.permute.xlu0 %433 }
 0x9a6   :  { %v436_v28 = vmul.f32 %v3816_v26, %v434_v27 }
 0x9a8   :  { %3817 = vtanh.f32 %v436_v28 }
 0x9b2   :  { %v3818_v29 = vpop.eup %3817 }
 0x9b3   :  { %439 = vrot.lane.b32.xlu1 %v3818_v29, %s4001_s20 }
 0xa25   :  { %v440_v30 = vpop.permute.xlu1 %439 }
 0xa26   :  { %v442_v31 = vmul.f32 %v3816_v26, %v440_v30 }
 0xa28   :  { %444 = vrot.lane.b32.xlu0 %v442_v31, %s4002_s21 }
 0xa9a   :  { %v445_v32 = vpop.permute.xlu0 %444 }
 0xa9b   :  { %3295 = vmatmul.mubr.msk.f32.vlgmr.msra.gmra.mrb[4].mxu0 %vm71_vm1, %v445_v32 }
 0xa9c   :  { %3621 = vmatpush3.bf16.msra.mxu0 %v4040_v12  ;;  %3316 = vmatprep.mubr.msk.f32.mxu0 %vm3999_vm0, %v4000_v14 }
 0xa9d   :  { %3622 = vmatprep.subr.bf16.mxu0 %v3998_v11 }
 0xaa0   :  { %3624 = vmatpush3.bf16.msra.mxu0 %v4051_v15 }
 0xaa1   :  { %3631 = vmatprep.subr.bf16.mxu0 %v3998_v11 }
 0xb6e   :  { %v514_v33 = vpop.f32.mrb[4].mxu0 }
 0xb6f   :  { %v515_v35 = vadd.f32 %v4100_v41, %v514_v33  ;;  %v3296_v37 = vpop.f32.mrb[5].mxu0 }
 0xb71   :  { %3819 = vtanh.f32 %v515_v35  ;;  %v3042_v39 = vmul.f32 -1.442695, %v515_v35 }
 0xb73   :  { %3821 = vpow2.f32 %v3042_v39 }
 0xb7b   :  { %v3820_v38 = vpop.eup %3819 }
 0xb7c   :  { %526 = vrot.lane.b32.xlu1 %v3820_v38, %s3997_s11 }
 0xb7d   :  { %v3822_v40 = vpop.eup %3821 }
 0xb7e   :  { %v521_v42 = vadd.f32 1.0, %v3822_v40 }
 0xb80   :  { %3823 = vrcp.f32 %v521_v42 }
 0xb8a   :  { %v3824_v43 = vpop.eup %3823 }
 0xbee   :  { %v527_v44 = vpop.permute.xlu1 %526 }
 0xbef   :  { %v529_v45 = vmul.f32 %v3824_v43, %v527_v44 }
 0xbf1   :  { %3825 = vtanh.f32 %v529_v45 }
 0xbfb   :  { %v3826_v46 = vpop.eup %3825 }
 0xbfc   :  { %532 = vrot.lane.b32.xlu0 %v3826_v46, %s4001_s20 }
 0xc6e   :  { %v533_v47 = vpop.permute.xlu0 %532 }
 0xc6f   :  { %v535_v48 = vmul.f32 %v3824_v43, %v533_v47 }
 0xc71   :  { %537 = vrot.lane.b32.xlu1 %v535_v48, %s4002_s21 }
 0xce3   :  { %v4172_v49 = vpop.permute.xlu1 %537 }
 0xce4   :  { %3306 = vmatmul.mubr.msk.f32.vlgmr.msra.gmra.mrb[4].mxu1 %vm71_vm1, %v4172_v49 }
 0xce5   :  { %3627 = vmatpush3.bf16.msra.mxu1 %v4077_v34  ;;  %3327 = vmatprep.mubr.msk.f32.mxu1 %vm3999_vm0, %v4000_v14 }
 0xce6   :  { %3628 = vmatprep.subr.bf16.mxu1 %v3998_v11 }
 0xce9   :  { %3630 = vmatpush3.bf16.msra.mxu1 %v4083_v36 }
 0xcea   :  { %3637 = vmatprep.subr.bf16.mxu1 %v3998_v11 }
 0xdb7   :  { %v607_v50 = vpop.f32.mrb[4].mxu1 }
 0xdb8   :  { %v611_v51 = vadd.f32 %v607_v50, %v4143_v3  ;;  %v3307_v52 = vpop.f32.mrb[5].mxu1 }
 0xdba   :  { %v4184_v53 = vadd.f32 %v4139_v62, %v611_v51 }
 0xdbc   :  { %3827 = vtanh.f32 %v4184_v53  ;;  %v3044_v56 = vmul.f32 -1.442695, %v4184_v53 }
 0xdbe   :  { %3829 = vpow2.f32 %v3044_v56 }
 0xdc6   :  { %v3828_v54 = vpop.eup %3827 }
 0xdc7   :  { %621 = vrot.lane.b32.xlu0 %v3828_v54, %s3997_s11 }
 0xdc8   :  { %v3830_v58 = vpop.eup %3829 }
 0xdc9   :  { %v616_v59 = vadd.f32 1.0, %v3830_v58 }
 0xdcb   :  { %3831 = vrcp.f32 %v616_v59 }
 0xdd5   :  { %v3832_v60 = vpop.eup %3831 }
 0xe39   :  { %v622_v63 = vpop.permute.xlu0 %621 }
 0xe3a   :  { %v624_v1 = vmul.f32 %v3832_v60, %v622_v63 }
 0xe3c   :  { %3833 = vtanh.f32 %v624_v1 }
 0xe46   :  { %v3834_v2 = vpop.eup %3833 }
 0xe47   :  { %627 = vrot.lane.b32.xlu1 %v3834_v2, %s4001_s20 }
 0xeb9   :  { %v628_v3 = vpop.permute.xlu1 %627 }
 0xeba   :  { %v630_v4 = vmul.f32 %v3832_v60, %v628_v3 }
 0xebc   :  { %632 = vrot.lane.b32.xlu0 %v630_v4, %s4002_s21 }
 0xf2e   :  { %v633_v5 = vpop.permute.xlu0 %632 }
 0xf2f   :  { %3317 = vmatmul.mubr.msk.f32.vlgmr.msra.gmra.mrb[6].mxu0 %vm71_vm1, %v633_v5 }
 0xf30   :  { %3633 = vmatpush3.bf16.msra.mxu0 %v4113_v55  ;;  %3338 = vmatprep.mubr.msk.f32.mxu0 %vm3999_vm0, %v4000_v14 }
 0xf31   :  { %3634 = vmatprep.subr.bf16.mxu0 %v3998_v11 }
 0xf34   :  { %3636 = vmatpush3.bf16.msra.mxu0 %v4119_v57 }
 0xf35   :  { %3643 = vmatprep.subr.bf16.mxu0 %v3998_v11 }
0x1002   :  { %v702_v6 = vpop.f32.mrb[6].mxu0 }
0x1003   :  { %v703_v7 = vadd.f32 %v4064_v20, %v702_v6  ;;  %v3318_v8 = vpop.f32.mrb[7].mxu0 }
0x1005   :  { %3835 = vtanh.f32 %v703_v7  ;;  %v3046_v10 = vmul.f32 -1.442695, %v703_v7 }
0x1007   :  { %3837 = vpow2.f32 %v3046_v10 }
0x100f   :  { %v3836_v9 = vpop.eup %3835 }
0x1010   :  { %714 = vrot.lane.b32.xlu1 %v3836_v9, %s3997_s11 }
0x1011   :  { %v3838_v0 = vpop.eup %3837 }
0x1012   :  { %v709_v13 = vadd.f32 1.0, %v3838_v0 }
0x1014   :  { %3839 = vrcp.f32 %v709_v13 }
0x101e   :  { %v3840_v16 = vpop.eup %3839 }
0x1082   :  { %v715_v17 = vpop.permute.xlu1 %714 }
0x1083   :  { %v717_v18 = vmul.f32 %v3840_v16, %v715_v17 }
0x1085   :  { %3841 = vtanh.f32 %v717_v18 }
0x108f   :  { %v3842_v19 = vpop.eup %3841 }
0x1090   :  { %720 = vrot.lane.b32.xlu0 %v3842_v19, %s4001_s20 }
0x1102   :  { %v721_v21 = vpop.permute.xlu0 %720 }
0x1103   :  { %v723_v22 = vmul.f32 %v3840_v16, %v721_v21 }
0x1105   :  { %725 = vrot.lane.b32.xlu1 %v723_v22, %s4002_s21 }
0x1177   :  { %v726_v23 = vpop.permute.xlu1 %725 }
0x1178   :  { %3328 = vmatmul.mubr.msk.f32.vlgmr.msra.gmra.mrb[6].mxu1 %vm71_vm1, %v726_v23 }
0x1179   :  { %3639 = vmatpush3.bf16.msra.mxu1 %v4040_v12  ;;  %3349 = vmatprep.mubr.msk.f32.mxu1 %vm3999_vm0, %v4000_v14 }
0x117a   :  { %3640 = vmatprep.subr.bf16.mxu1 %v3998_v11 }
0x117d   :  { %3642 = vmatpush3.bf16.msra.mxu1 %v4051_v15 }
0x117e   :  { %3649 = vmatprep.subr.bf16.mxu1 %v3998_v11 }
0x124b   :  { %v795_v24 = vpop.f32.mrb[6].mxu1 }
0x124c   :  { %v796_v25 = vadd.f32 %v4100_v41, %v795_v24  ;;  %v3329_v26 = vpop.f32.mrb[7].mxu1 }
0x124e   :  { %3843 = vtanh.f32 %v796_v25  ;;  %v3048_v28 = vmul.f32 -1.442695, %v796_v25 }
0x1250   :  { %3845 = vpow2.f32 %v3048_v28 }
0x1258   :  { %v3844_v27 = vpop.eup %3843 }
0x1259   :  { %807 = vrot.lane.b32.xlu0 %v3844_v27, %s3997_s11 }
0x125a   :  { %v3846_v29 = vpop.eup %3845 }
0x125b   :  { %v802_v30 = vadd.f32 1.0, %v3846_v29 }
0x125d   :  { %3847 = vrcp.f32 %v802_v30 }
0x1267   :  { %v3848_v31 = vpop.eup %3847 }
0x12cb   :  { %v808_v32 = vpop.permute.xlu0 %807 }
0x12cc   :  { %v810_v33 = vmul.f32 %v3848_v31, %v808_v32 }
0x12ce   :  { %3849 = vtanh.f32 %v810_v33 }
0x12d8   :  { %v3850_v35 = vpop.eup %3849 }
0x12d9   :  { %813 = vrot.lane.b32.xlu1 %v3850_v35, %s4001_s20 }
0x134b   :  { %v814_v37 = vpop.permute.xlu1 %813 }
0x134c   :  { %v816_v38 = vmul.f32 %v3848_v31, %v814_v37 }
0x134e   :  { %818 = vrot.lane.b32.xlu0 %v816_v38, %s4002_s21 }
0x13c0   :  { %v4213_v39 = vpop.permute.xlu0 %818 }
0x13c1   :  { %3339 = vmatmul.mubr.msk.f32.vlgmr.msra.gmra.mrb[8].mxu0 %vm71_vm1, %v4213_v39 }
0x13c2   :  { %3645 = vmatpush3.bf16.msra.mxu0 %v4077_v34  ;;  %3360 = vmatprep.mubr.msk.f32.mxu0 %vm3999_vm0, %v4000_v14 }
0x13c3   :  { %3646 = vmatprep.subr.bf16.mxu0 %v3998_v11 }
0x13c6   :  { %3648 = vmatpush3.bf16.msra.mxu0 %v4083_v36 }
0x13c7   :  { %3655 = vmatprep.subr.bf16.mxu0 %v3998_v11 }
0x1494   :  { %v888_v40 = vpop.f32.mrb[8].mxu0 }
0x1495   :  { %v892_v42 = vadd.f32 %v888_v40, %v4184_v53  ;;  %v3340_v43 = vpop.f32.mrb[9].mxu0 }
0x1497   :  { %v4225_v44 = vadd.f32 %v4139_v62, %v892_v42 }
0x1499   :  { %3851 = vtanh.f32 %v4225_v44  ;;  %v3050_v46 = vmul.f32 -1.442695, %v4225_v44 }
0x149b   :  { %3853 = vpow2.f32 %v3050_v46 }
0x14a3   :  { %v3852_v45 = vpop.eup %3851 }
0x14a4   :  { %902 = vrot.lane.b32.xlu1 %v3852_v45, %s3997_s11 }
0x14a5   :  { %v3854_v47 = vpop.eup %3853 }
0x14a6   :  { %v897_v48 = vadd.f32 1.0, %v3854_v47 }
0x14a8   :  { %3855 = vrcp.f32 %v897_v48 }
0x14b2   :  { %v3856_v50 = vpop.eup %3855 }
0x1516   :  { %v903_v51 = vpop.permute.xlu1 %902 }
0x1517   :  { %v905_v52 = vmul.f32 %v3856_v50, %v903_v51 }
0x1519   :  { %3857 = vtanh.f32 %v905_v52 }
0x1523   :  { %v3858_v53 = vpop.eup %3857 }
0x1524   :  { %908 = vrot.lane.b32.xlu0 %v3858_v53, %s4001_s20 }
0x1596   :  { %v909_v54 = vpop.permute.xlu0 %908 }
0x1597   :  { %v911_v56 = vmul.f32 %v3856_v50, %v909_v54 }
0x1599   :  { %913 = vrot.lane.b32.xlu1 %v911_v56, %s4002_s21 }
0x160b   :  { %v914_v58 = vpop.permute.xlu1 %913 }
0x160c   :  { %3350 = vmatmul.mubr.msk.f32.vlgmr.msra.gmra.mrb[8].mxu1 %vm71_vm1, %v914_v58 }
0x160d   :  { %3651 = vmatpush3.bf16.msra.mxu1 %v4113_v55  ;;  %3371 = vmatprep.mubr.msk.f32.mxu1 %vm3999_vm0, %v4000_v14 }
0x160e   :  { %3652 = vmatprep.subr.bf16.mxu1 %v3998_v11 }
0x1611   :  { %3654 = vmatpush3.bf16.msra.mxu1 %v4119_v57 }
0x1612   :  { %3661 = vmatprep.subr.bf16.mxu1 %v3998_v11 }
0x16df   :  { %v983_v59 = vpop.f32.mrb[8].mxu1 }
0x16e0   :  { %v984_v60 = vadd.f32 %v4064_v20, %v983_v59  ;;  %v3351_v63 = vpop.f32.mrb[9].mxu1 }
0x16e2   :  { %3859 = vtanh.f32 %v984_v60  ;;  %v3052_v2 = vmul.f32 -1.442695, %v984_v60 }
0x16e4   :  { %3861 = vpow2.f32 %v3052_v2 }
0x16ec   :  { %v3860_v1 = vpop.eup %3859 }
0x16ed   :  { %995 = vrot.lane.b32.xlu0 %v3860_v1, %s3997_s11 }
0x16ee   :  { %v3862_v3 = vpop.eup %3861 }
0x16ef   :  { %v990_v4 = vadd.f32 1.0, %v3862_v3 }
0x16f1   :  { %3863 = vrcp.f32 %v990_v4 }
0x16fb   :  { %v3864_v5 = vpop.eup %3863 }
0x175f   :  { %v996_v6 = vpop.permute.xlu0 %995 }
0x1760   :  { %v998_v7 = vmul.f32 %v3864_v5, %v996_v6 }
0x1762   :  { %3865 = vtanh.f32 %v998_v7 }
0x176c   :  { %v3866_v8 = vpop.eup %3865 }
0x176d   :  { %1001 = vrot.lane.b32.xlu1 %v3866_v8, %s4001_s20 }
0x17df   :  { %v1002_v9 = vpop.permute.xlu1 %1001 }
0x17e0   :  { %v1004_v10 = vmul.f32 %v3864_v5, %v1002_v9 }
0x17e2   :  { %1006 = vrot.lane.b32.xlu0 %v1004_v10, %s4002_s21 }
0x1854   :  { %v1007_v0 = vpop.permute.xlu0 %1006 }
0x1855   :  { %3361 = vmatmul.mubr.msk.f32.vlgmr.msra.gmra.mrb[10].mxu0 %vm71_vm1, %v1007_v0 }
0x1856   :  { %3657 = vmatpush3.bf16.msra.mxu0 %v4040_v12  ;;  %3382 = vmatprep.mubr.msk.f32.mxu0 %vm3999_vm0, %v4000_v14 }
0x1857   :  { %3658 = vmatprep.subr.bf16.mxu0 %v3998_v11 }
0x185a   :  { %3660 = vmatpush3.bf16.msra.mxu0 %v4051_v15 }
0x185b   :  { %3667 = vmatprep.subr.bf16.mxu0 %v3998_v11 }
0x1928   :  { %v1076_v13 = vpop.f32.mrb[10].mxu0 }
0x1929   :  { %v1077_v16 = vadd.f32 %v4100_v41, %v1076_v13  ;;  %v3362_v17 = vpop.f32.mrb[11].mxu0 }
0x192b   :  { %3867 = vtanh.f32 %v1077_v16  ;;  %v3054_v19 = vmul.f32 -1.442695, %v1077_v16 }
0x192d   :  { %3869 = vpow2.f32 %v3054_v19 }
0x1935   :  { %v3868_v18 = vpop.eup %3867 }
0x1936   :  { %1088 = vrot.lane.b32.xlu1 %v3868_v18, %s3997_s11 }
0x1937   :  { %v3870_v21 = vpop.eup %3869 }
0x1938   :  { %v1083_v22 = vadd.f32 1.0, %v3870_v21 }
0x193a   :  { %3871 = vrcp.f32 %v1083_v22 }
0x1944   :  { %v3872_v23 = vpop.eup %3871 }
0x19a8   :  { %v1089_v24 = vpop.permute.xlu1 %1088 }
0x19a9   :  { %v1091_v25 = vmul.f32 %v3872_v23, %v1089_v24 }
0x19ab   :  { %3873 = vtanh.f32 %v1091_v25 }
0x19b5   :  { %v3874_v26 = vpop.eup %3873 }
0x19b6   :  { %1094 = vrot.lane.b32.xlu0 %v3874_v26, %s4001_s20 }
0x1a28   :  { %v1095_v27 = vpop.permute.xlu0 %1094 }
0x1a29   :  { %v1097_v28 = vmul.f32 %v3872_v23, %v1095_v27 }
0x1a2b   :  { %1099 = vrot.lane.b32.xlu1 %v1097_v28, %s4002_s21 }
0x1a9d   :  { %v4254_v29 = vpop.permute.xlu1 %1099 }
0x1a9e   :  { %3372 = vmatmul.mubr.msk.f32.vlgmr.msra.gmra.mrb[10].mxu1 %vm71_vm1, %v4254_v29 }
0x1a9f   :  { %3663 = vmatpush3.bf16.msra.mxu1 %v4077_v34  ;;  %3393 = vmatprep.mubr.msk.f32.mxu1 %vm3999_vm0, %v4000_v14 }
0x1aa0   :  { %3664 = vmatprep.subr.bf16.mxu1 %v3998_v11 }
0x1aa3   :  { %3666 = vmatpush3.bf16.msra.mxu1 %v4083_v36 }
0x1aa4   :  { %3673 = vmatprep.subr.bf16.mxu1 %v3998_v11 }
0x1b71   :  { %v1169_v30 = vpop.f32.mrb[10].mxu1 }
0x1b72   :  { %v1173_v31 = vadd.f32 %v1169_v30, %v4225_v44  ;;  %v3373_v32 = vpop.f32.mrb[11].mxu1 }
0x1b74   :  { %v4266_v33 = vadd.f32 %v4139_v62, %v1173_v31 }
0x1b76   :  { %3875 = vtanh.f32 %v4266_v33  ;;  %v3056_v37 = vmul.f32 -1.442695, %v4266_v33 }
0x1b78   :  { %3877 = vpow2.f32 %v3056_v37 }
0x1b80   :  { %v3876_v35 = vpop.eup %3875 }
0x1b81   :  { %1183 = vrot.lane.b32.xlu0 %v3876_v35, %s3997_s11 }
0x1b82   :  { %v3878_v38 = vpop.eup %3877 }
0x1b83   :  { %v1178_v40 = vadd.f32 1.0, %v3878_v38 }
0x1b85   :  { %3879 = vrcp.f32 %v1178_v40 }
0x1b8f   :  { %v3880_v42 = vpop.eup %3879 }
0x1bf3   :  { %v1184_v43 = vpop.permute.xlu0 %1183 }
0x1bf4   :  { %v1186_v45 = vmul.f32 %v3880_v42, %v1184_v43 }
0x1bf6   :  { %3881 = vtanh.f32 %v1186_v45 }
0x1c00   :  { %v3882_v44 = vpop.eup %3881 }
0x1c01   :  { %1189 = vrot.lane.b32.xlu1 %v3882_v44, %s4001_s20 }
0x1c73   :  { %v1190_v46 = vpop.permute.xlu1 %1189 }
0x1c74   :  { %v1192_v47 = vmul.f32 %v3880_v42, %v1190_v46 }
0x1c76   :  { %1194 = vrot.lane.b32.xlu0 %v1192_v47, %s4002_s21 }
0x1ce8   :  { %v1195_v48 = vpop.permute.xlu0 %1194 }
0x1ce9   :  { %3383 = vmatmul.mubr.msk.f32.vlgmr.msra.gmra.mrb[12].mxu0 %vm71_vm1, %v1195_v48 }
0x1cea   :  { %3669 = vmatpush3.bf16.msra.mxu0 %v4113_v55  ;;  %3404 = vmatprep.mubr.msk.f32.mxu0 %vm3999_vm0, %v4000_v14 }
0x1ceb   :  { %3670 = vmatprep.subr.bf16.mxu0 %v3998_v11 }
0x1cee   :  { %3672 = vmatpush3.bf16.msra.mxu0 %v4119_v57 }
0x1cef   :  { %3679 = vmatprep.subr.bf16.mxu0 %v3998_v11 }
0x1dbc   :  { %v1264_v50 = vpop.f32.mrb[12].mxu0 }
0x1dbd   :  { %v1265_v51 = vadd.f32 %v4064_v20, %v1264_v50  ;;  %v3384_v52 = vpop.f32.mrb[13].mxu0 }
0x1dbf   :  { %3883 = vtanh.f32 %v1265_v51  ;;  %v3058_v54 = vmul.f32 -1.442695, %v1265_v51 }
0x1dc1   :  { %3885 = vpow2.f32 %v3058_v54 }
0x1dc9   :  { %v3884_v53 = vpop.eup %3883 }
0x1dca   :  { %1276 = vrot.lane.b32.xlu1 %v3884_v53, %s3997_s11 }
0x1dcb   :  { %v3886_v56 = vpop.eup %3885 }
0x1dcc   :  { %v1271_v58 = vadd.f32 1.0, %v3886_v56 }
0x1dce   :  { %3887 = vrcp.f32 %v1271_v58 }
0x1dd8   :  { %v3888_v59 = vpop.eup %3887 }
0x1e3c   :  { %v1277_v60 = vpop.permute.xlu1 %1276 }
0x1e3d   :  { %v1279_v63 = vmul.f32 %v3888_v59, %v1277_v60 }
0x1e3f   :  { %3889 = vtanh.f32 %v1279_v63 }
0x1e49   :  { %v3890_v1 = vpop.eup %3889 }
0x1e4a   :  { %1282 = vrot.lane.b32.xlu0 %v3890_v1, %s4001_s20 }
0x1ebc   :  { %v1283_v2 = vpop.permute.xlu0 %1282 }
0x1ebd   :  { %v1285_v3 = vmul.f32 %v3888_v59, %v1283_v2 }
0x1ebf   :  { %1287 = vrot.lane.b32.xlu1 %v1285_v3, %s4002_s21 }
0x1f31   :  { %v1288_v4 = vpop.permute.xlu1 %1287 }
0x1f32   :  { %3394 = vmatmul.mubr.msk.f32.vlgmr.msra.gmra.mrb[12].mxu1 %vm71_vm1, %v1288_v4 }
0x1f33   :  { %3675 = vmatpush3.bf16.msra.mxu1 %v4040_v12  ;;  %3415 = vmatprep.mubr.msk.f32.mxu1 %vm3999_vm0, %v4000_v14 }
0x1f34   :  { %3676 = vmatprep.subr.bf16.mxu1 %v3998_v11 }
0x1f37   :  { %3678 = vmatpush3.bf16.msra.mxu1 %v4051_v15 }
0x1f38   :  { %3685 = vmatprep.subr.bf16.mxu1 %v3998_v11 }
0x2005   :  { %v1357_v5 = vpop.f32.mrb[12].mxu1 }
0x2006   :  { %v1358_v6 = vadd.f32 %v4100_v41, %v1357_v5  ;;  %v3395_v7 = vpop.f32.mrb[13].mxu1 }
0x2008   :  { %3891 = vtanh.f32 %v1358_v6  ;;  %v3060_v9 = vmul.f32 -1.442695, %v1358_v6 }
0x200a   :  { %3893 = vpow2.f32 %v3060_v9 }
0x2012   :  { %v3892_v8 = vpop.eup %3891 }
0x2013   :  { %1369 = vrot.lane.b32.xlu0 %v3892_v8, %s3997_s11 }
0x2014   :  { %v3894_v10 = vpop.eup %3893 }
0x2015   :  { %v1364_v0 = vadd.f32 1.0, %v3894_v10 }
0x2017   :  { %3895 = vrcp.f32 %v1364_v0 }
0x2021   :  { %v3896_v13 = vpop.eup %3895 }
0x2085   :  { %v1370_v16 = vpop.permute.xlu0 %1369 }
0x2086   :  { %v1372_v17 = vmul.f32 %v3896_v13, %v1370_v16 }
0x2088   :  { %3897 = vtanh.f32 %v1372_v17 }
0x2092   :  { %v3898_v18 = vpop.eup %3897 }
0x2093   :  { %1375 = vrot.lane.b32.xlu1 %v3898_v18, %s4001_s20 }
0x2105   :  { %v1376_v19 = vpop.permute.xlu1 %1375 }
0x2106   :  { %v1378_v21 = vmul.f32 %v3896_v13, %v1376_v19 }
0x2108   :  { %1380 = vrot.lane.b32.xlu0 %v1378_v21, %s4002_s21 }
0x217a   :  { %v4295_v22 = vpop.permute.xlu0 %1380 }
0x217b   :  { %3405 = vmatmul.mubr.msk.f32.vlgmr.msra.gmra.mrb[14].mxu0 %vm71_vm1, %v4295_v22 }
0x217c   :  { %3681 = vmatpush3.bf16.msra.mxu0 %v4077_v34  ;;  %3426 = vmatprep.mubr.msk.f32.mxu0 %vm3999_vm0, %v4000_v14 }
0x217d   :  { %3682 = vmatprep.subr.bf16.mxu0 %v3998_v11 }
0x2180   :  { %3684 = vmatpush3.bf16.msra.mxu0 %v4083_v36 }
0x2181   :  { %3691 = vmatprep.subr.bf16.mxu0 %v3998_v11 }
0x224e   :  { %v1450_v23 = vpop.f32.mrb[14].mxu0 }
0x224f   :  { %v1454_v24 = vadd.f32 %v1450_v23, %v4266_v33  ;;  %v3406_v25 = vpop.f32.mrb[15].mxu0 }
0x2251   :  { %v4307_v26 = vadd.f32 %v4139_v62, %v1454_v24 }
0x2253   :  { %3899 = vtanh.f32 %v4307_v26  ;;  %v3062_v28 = vmul.f32 -1.442695, %v4307_v26 }
0x2255   :  { %3901 = vpow2.f32 %v3062_v28 }
0x225d   :  { %v3900_v27 = vpop.eup %3899 }
0x225e   :  { %1464 = vrot.lane.b32.xlu1 %v3900_v27, %s3997_s11 }
0x225f   :  { %v3902_v30 = vpop.eup %3901 }
0x2260   :  { %v1459_v31 = vadd.f32 1.0, %v3902_v30 }
0x2262   :  { %3903 = vrcp.f32 %v1459_v31 }
0x226c   :  { %v3904_v32 = vpop.eup %3903 }
0x22d0   :  { %v1465_v35 = vpop.permute.xlu1 %1464 }
0x22d1   :  { %v1467_v37 = vmul.f32 %v3904_v32, %v1465_v35 }
0x22d3   :  { %3905 = vtanh.f32 %v1467_v37  ;;  %v4365_v37 = vld [vmem:[%s4562_s0 + $0x28] ss:$0 sm:$0xff] }
0x22dd   :  { %v3906_v33 = vpop.eup %3905 }
0x22de   :  { %1470 = vrot.lane.b32.xlu0 %v3906_v33, %s4001_s20 }
0x2350   :  { %v1471_v38 = vpop.permute.xlu0 %1470 }
0x2351   :  { %v1473_v40 = vmul.f32 %v3904_v32, %v1471_v38 }
0x2353   :  { %1475 = vrot.lane.b32.xlu1 %v1473_v40, %s4002_s21 }
0x23c5   :  { %v1476_v42 = vpop.permute.xlu1 %1475 }
0x23c6   :  { %3416 = vmatmul.mubr.msk.f32.vlgmr.msra.gmra.mrb[14].mxu1 %vm71_vm1, %v1476_v42 }
0x23c7   :  { %3687 = vmatpush3.bf16.msra.mxu1 %v4113_v55  ;;  %3437 = vmatprep.mubr.msk.f32.mxu1 %vm3999_vm0, %v4000_v14 }
0x23c8   :  { %3688 = vmatprep.subr.bf16.mxu1 %v3998_v11 }
0x23cb   :  { %3690 = vmatpush3.bf16.msra.mxu1 %v4119_v57 }
0x23cc   :  { %3697 = vmatprep.subr.bf16.mxu1 %v3998_v11 }
0x2499   :  { %v1545_v43 = vpop.f32.mrb[14].mxu1 }
0x249a   :  { %v1546_v45 = vadd.f32 %v4064_v20, %v1545_v43  ;;  %v3417_v44 = vpop.f32.mrb[15].mxu1 }
0x249c   :  { %3907 = vtanh.f32 %v1546_v45  ;;  %v3064_v47 = vmul.f32 -1.442695, %v1546_v45 }
0x249e   :  { %3909 = vpow2.f32 %v3064_v47 }
0x24a6   :  { %v3908_v46 = vpop.eup %3907 }
0x24a7   :  { %1557 = vrot.lane.b32.xlu0 %v3908_v46, %s3997_s11 }
0x24a8   :  { %v3910_v48 = vpop.eup %3909 }
0x24a9   :  { %v1552_v50 = vadd.f32 1.0, %v3910_v48 }
0x24ab   :  { %3911 = vrcp.f32 %v1552_v50 }
0x24b5   :  { %v3912_v51 = vpop.eup %3911 }
0x2519   :  { %v1558_v52 = vpop.permute.xlu0 %1557 }
0x251a   :  { %v1560_v53 = vmul.f32 %v3912_v51, %v1558_v52 }
0x251c   :  { %3913 = vtanh.f32 %v1560_v53 }
0x2526   :  { %v3914_v54 = vpop.eup %3913 }
0x2527   :  { %1563 = vrot.lane.b32.xlu1 %v3914_v54, %s4001_s20 }
0x2599   :  { %v1564_v56 = vpop.permute.xlu1 %1563 }
0x259a   :  { %v1566_v58 = vmul.f32 %v3912_v51, %v1564_v56 }
0x259c   :  { %1568 = vrot.lane.b32.xlu0 %v1566_v58, %s4002_s21 }
0x260e   :  { %v1569_v20 = vpop.permute.xlu0 %1568 }
0x260f   :  { %3427 = vmatmul.mubr.msk.f32.vlgmr.msra.gmra.mrb[16].mxu0 %vm71_vm1, %v1569_v20 }
0x2610   :  { %3693 = vmatpush3.bf16.msra.mxu0 %v4040_v12  ;;  %3448 = vmatprep.mubr.msk.f32.mxu0 %vm3999_vm0, %v4000_v14 }
0x2611   :  { %3694 = vmatprep.subr.bf16.mxu0 %v3998_v11 }
0x2614   :  { %3696 = vmatpush3.bf16.msra.mxu0 %v4051_v15 }
0x2615   :  { %3703 = vmatprep.subr.bf16.mxu0 %v3998_v11 }
0x26e2   :  { %v1638_v59 = vpop.f32.mrb[16].mxu0 }
0x26e3   :  { %v1639_v60 = vadd.f32 %v4100_v41, %v1638_v59  ;;  %v3428_v63 = vpop.f32.mrb[17].mxu0 }
0x26e5   :  { %3915 = vtanh.f32 %v1639_v60  ;;  %v3066_v2 = vmul.f32 -1.442695, %v1639_v60 }
0x26e7   :  { %3917 = vpow2.f32 %v3066_v2 }
0x26ef   :  { %v3916_v1 = vpop.eup %3915 }
0x26f0   :  { %1650 = vrot.lane.b32.xlu1 %v3916_v1, %s3997_s11 }
0x26f1   :  { %v3918_v3 = vpop.eup %3917 }
0x26f2   :  { %v1645_v4 = vadd.f32 1.0, %v3918_v3 }
0x26f4   :  { %3919 = vrcp.f32 %v1645_v4 }
0x26fe   :  { %v3920_v5 = vpop.eup %3919 }
0x2762   :  { %v1651_v6 = vpop.permute.xlu1 %1650 }
0x2763   :  { %v1653_v7 = vmul.f32 %v3920_v5, %v1651_v6 }
0x2765   :  { %3921 = vtanh.f32 %v1653_v7 }
0x276f   :  { %v3922_v8 = vpop.eup %3921 }
0x2770   :  { %1656 = vrot.lane.b32.xlu0 %v3922_v8, %s4001_s20 }
0x27e2   :  { %v1657_v9 = vpop.permute.xlu0 %1656 }
0x27e3   :  { %v1659_v10 = vmul.f32 %v3920_v5, %v1657_v9 }
0x27e5   :  { %1661 = vrot.lane.b32.xlu1 %v1659_v10, %s4002_s21 }
0x2857   :  { %v4336_v0 = vpop.permute.xlu1 %1661 }
0x2858   :  { %3438 = vmatmul.mubr.msk.f32.vlgmr.msra.gmra.mrb[16].mxu1 %vm71_vm1, %v4336_v0 }
0x2859   :  { %3699 = vmatpush3.bf16.msra.mxu1 %v4077_v34  ;;  %3459 = vmatprep.mubr.msk.f32.mxu1 %vm3999_vm0, %v4000_v14 }
0x285a   :  { %3700 = vmatprep.subr.bf16.mxu1 %v3998_v11 }
0x285d   :  { %3702 = vmatpush3.bf16.msra.mxu1 %v4083_v36 }
0x285e   :  { %3709 = vmatprep.subr.bf16.mxu1 %v3998_v11 }
0x292b   :  { %v1731_v13 = vpop.f32.mrb[16].mxu1 }
0x292c   :  { %v1735_v16 = vadd.f32 %v1731_v13, %v4307_v26  ;;  %v3439_v17 = vpop.f32.mrb[17].mxu1 }
0x292e   :  { %v4348_v18 = vadd.f32 %v4139_v62, %v1735_v16 }
0x2930   :  { %3923 = vtanh.f32 %v4348_v18  ;;  %v3068_v21 = vmul.f32 -1.442695, %v4348_v18 }
0x2932   :  { %3925 = vpow2.f32 %v3068_v21  ;;  %v30_v21 = vld [vmem:[%s4563_s1 + $0x10] sm:$0xff] }
0x293a   :  { %v3924_v19 = vpop.eup %3923 }
0x293b   :  { %1745 = vrot.lane.b32.xlu0 %v3924_v19, %s3997_s11 }
0x293c   :  { %v3926_v23 = vpop.eup %3925 }
0x293d   :  { %v1740_v24 = vadd.f32 1.0, %v3926_v23  ;;  %v31_v23 = vld [vmem:[%s4563_s1 + $0x18] sm:$0xff] }
0x293f   :  { %3927 = vrcp.f32 %v1740_v24 }
0x2949   :  { %v3928_v25 = vpop.eup %3927 }
0x29ad   :  { %v1746_v27 = vpop.permute.xlu0 %1745 }
0x29ae   :  { %v1748_v28 = vmul.f32 %v3928_v25, %v1746_v27 }
0x29b0   :  { %3929 = vtanh.f32 %v1748_v28  ;;  %v4003_v28 = vmov 1966171168  }
0x29ba   :  { %v3930_v26 = vpop.eup %3929 }
0x29bb   :  { %1751 = vrot.lane.b32.xlu1 %v3930_v26, %s4001_s20  ;;  %v2295_v26 = vunpack.c.l.s4 %v4003_v28 }
0x2a2d   :  { %v1752_v30 = vpop.permute.xlu1 %1751 }
0x2a2e   :  { %v1754_v31 = vmul.f32 %v3928_v25, %v1752_v30  ;;  %v4410_v25 = vpack.c.bf16 %v31_v23, %v30_v21  ;;  %v2297_v30 = vlaneseq }
0x2a30   :  { %1756 = vrot.lane.b32.xlu0 %v1754_v31, %s4002_s21  ;;  %v2298_v31 = vshrl.u32 %v2297_v30, 7 }
0x2aa2   :  { %v1757_v32 = vpop.permute.xlu0 %1756 }
0x2aa3   :  { %3449 = vmatmul.mubr.msk.f32.vlgmr.msra.gmra.mrb[18].mxu0 %vm71_vm1, %v1757_v32  ;;  %v4445_v32 = vld [vmem:[%s4563_s1 + $0x20] ss:$0 sm:$0xff] }
0x2aa4   :  { %3705 = vmatpush3.bf16.msra.mxu0 %v4113_v55  ;;  %3470 = vmatprep.mubr.msk.f32.mxu0 %vm3999_vm0, %v4000_v14 }
0x2aa5   :  { %3706 = vmatprep.subr.bf16.mxu0 %v3998_v11 }
0x2aa8   :  { %3708 = vmatpush3.bf16.msra.mxu0 %v4119_v57 }
0x2aa9   :  { %3715 = vmatprep.subr.bf16.mxu0 %v3998_v11 }
0x2b76   :  { %v1826_v35 = vpop.f32.mrb[18].mxu0 }
0x2b77   :  { %v1827_v33 = vadd.f32 %v4365_v37, %v1826_v35  ;;  %v3450_v38 = vpop.f32.mrb[19].mxu0  ;;  %v33_v35 = vld [vmem:[%s4563_s1 + $0x28] sm:$0x3] }
0x2b79   :  { %3931 = vtanh.f32 %v1827_v33  ;;  %v3070_v40 = vmul.f32 -1.442695, %v1827_v33 }
0x2b7b   :  { %3933 = vpow2.f32 %v3070_v40 }
0x2b83   :  { %v3932_v55 = vpop.eup %3931 }
0x2b84   :  { %1838 = vrot.lane.b32.xlu1 %v3932_v55, %s3997_s11 }
0x2b85   :  { %v3934_v42 = vpop.eup %3933 }
0x2b86   :  { %v1833_v43 = vadd.f32 1.0, %v3934_v42 }
0x2b88   :  { %3935 = vrcp.f32 %v1833_v43 }
0x2b92   :  { %v3936_v57 = vpop.eup %3935 }
0x2bf6   :  { %v1839_v45 = vpop.permute.xlu1 %1838 }
0x2bf7   :  { %v1841_v44 = vmul.f32 %v3936_v57, %v1839_v45 }
0x2bf9   :  { %3937 = vtanh.f32 %v1841_v44 }
0x2c03   :  { %v3938_v46 = vpop.eup %3937 }
0x2c04   :  { %1844 = vrot.lane.b32.xlu0 %v3938_v46, %s4001_s20 }
0x2c76   :  { %v1845_v47 = vpop.permute.xlu0 %1844 }
0x2c77   :  { %v1847_v48 = vmul.f32 %v3936_v57, %v1845_v47 }
0x2c79   :  { %1849 = vrot.lane.b32.xlu1 %v1847_v48, %s4002_s21 }
0x2ceb   :  { %v1850_v50 = vpop.permute.xlu1 %1849 }
0x2cec   :  { %3460 = vmatmul.mubr.msk.f32.vlgmr.msra.gmra.mrb[18].mxu1 %vm71_vm1, %v1850_v50 }
0x2ced   :  { %3711 = vmatpush3.bf16.msra.mxu1 %v4040_v12  ;;  %3481 = vmatprep.mubr.msk.f32.mxu1 %vm3999_vm0, %v4000_v14 }
0x2cee   :  { %3712 = vmatprep.subr.bf16.mxu1 %v3998_v11 }
0x2cf1   :  { %3714 = vmatpush3.bf16.msra.mxu1 %v4051_v15 }
0x2cf2   :  { %3721 = vmatprep.subr.bf16.mxu1 %v3998_v11 }
0x2dbf   :  { %v1919_v51 = vpop.f32.mrb[18].mxu1 }
0x2dc0   :  { %v1920_v52 = vadd.f32 %v4100_v41, %v1919_v51  ;;  %v3461_v53 = vpop.f32.mrb[19].mxu1 }
0x2dc2   :  { %3939 = vtanh.f32 %v1920_v52  ;;  %v3072_v56 = vmul.f32 -1.442695, %v1920_v52 }
0x2dc4   :  { %3941 = vpow2.f32 %v3072_v56 }
0x2dcc   :  { %v3940_v54 = vpop.eup %3939 }
0x2dcd   :  { %1931 = vrot.lane.b32.xlu0 %v3940_v54, %s3997_s11 }
0x2dce   :  { %v3942_v12 = vpop.eup %3941 }
0x2dcf   :  { %v1926_v58 = vadd.f32 1.0, %v3942_v12 }
0x2dd1   :  { %3943 = vrcp.f32 %v1926_v58 }
0x2ddb   :  { %v3944_v20 = vpop.eup %3943 }
0x2e3f   :  { %v1932_v59 = vpop.permute.xlu0 %1931 }
0x2e40   :  { %v1934_v60 = vmul.f32 %v3944_v20, %v1932_v59 }
0x2e42   :  { %3945 = vtanh.f32 %v1934_v60 }
0x2e4c   :  { %v3946_v15 = vpop.eup %3945 }
0x2e4d   :  { %1937 = vrot.lane.b32.xlu1 %v3946_v15, %s4001_s20 }
0x2ebf   :  { %v1938_v63 = vpop.permute.xlu1 %1937 }
0x2ec0   :  { %v1940_v1 = vmul.f32 %v3944_v20, %v1938_v63 }
0x2ec2   :  { %1942 = vrot.lane.b32.xlu0 %v1940_v1, %s4002_s21 }
0x2f34   :  { %v1943_v41 = vpop.permute.xlu0 %1942 }
0x2f35   :  { %3471 = vmatmul.mubr.msk.f32.vlgmr.msra.gmra.mrb[20].mxu0 %vm71_vm1, %v1943_v41 }
0x2f36   :  { %3717 = vmatpush3.bf16.msra.mxu0 %v4077_v34  ;;  %3492 = vmatprep.mubr.msk.f32.mxu0 %vm3999_vm0, %v4000_v14 }
0x2f37   :  { %3718 = vmatprep.subr.bf16.mxu0 %v3998_v11 }
0x2f3a   :  { %3720 = vmatpush3.bf16.msra.mxu0 %v4083_v36 }
0x2f3b   :  { %3727 = vmatprep.subr.bf16.mxu0 %v3998_v11 }
0x3008   :  { %v2012_v2 = vpop.f32.mrb[20].mxu0 }
0x3009   :  { %v2016_v3 = vadd.f32 %v2012_v2, %v4348_v18  ;;  %v3472_v4 = vpop.f32.mrb[21].mxu0  ;;  %v29_v18 = vld [vmem:[%s4563_s1 + $0x8] sm:$0xff] }
0x300b   :  { %v2017_v5 = vadd.f32 %v4139_v62, %v2016_v3  ;;  %v28_v62 = vld [vmem:[%s4563_s1] sm:$0xff] }
0x300c   :  { %v4400_v19 = vpack.c.bf16 %v29_v18, %v28_v62 }
0x300d   :  { %3947 = vtanh.f32 %v2017_v5  ;;  %v3074_v34 = vmul.f32 -1.442695, %v2017_v5 }
0x300f   :  { %3949 = vpow2.f32 %v3074_v34 }
0x3017   :  { %v3948_v6 = vpop.eup %3947 }
0x3018   :  { %2026 = vrot.lane.b32.xlu1 %v3948_v6, %s3997_s11 }
0x3019   :  { %v3950_v7 = vpop.eup %3949 }
0x301a   :  { %v2021_v8 = vadd.f32 1.0, %v3950_v7 }
0x301c   :  { %3951 = vrcp.f32 %v2021_v8 }
0x3026   :  { %v3952_v9 = vpop.eup %3951 }
0x308a   :  { %v2027_v10 = vpop.permute.xlu1 %2026 }
0x308b   :  { %v2029_v36 = vmul.f32 %v3952_v9, %v2027_v10 }
0x308d   :  { %3953 = vtanh.f32 %v2029_v36 }
0x3097   :  { %v3954_v13 = vpop.eup %3953 }
0x3098   :  { %2032 = vrot.lane.b32.xlu0 %v3954_v13, %s4001_s20 }
0x310a   :  { %v2033_v16 = vpop.permute.xlu0 %2032 }
0x310b   :  { %v2035_v17 = vmul.f32 %v3952_v9, %v2033_v16 }
0x310d   :  { %2037 = vrot.lane.b32.xlu1 %v2035_v17, %s4002_s21 }
0x317f   :  { %v2038_v24 = vpop.permute.xlu1 %2037 }
0x3180   :  { %3482 = vmatmul.mubr.msk.f32.vlgmr.msra.gmra.mrb[20].mxu1 %vm71_vm1, %v2038_v24 }
0x3181   :  { %3723 = vmatpush3.bf16.msra.mxu1 %v4400_v19  ;;  %3503 = vmatprep.mubr.msk.f32.mxu1 %vm3999_vm0, %v4000_v14 }
0x3182   :  { %3724 = vmatprep.subr.bf16.mxu1 %v3998_v11 }
0x3185   :  { %3726 = vmatpush3.bf16.msra.mxu1 %v4410_v25 }
0x3186   :  { %3733 = vmatprep.subr.bf16.mxu1 %v3998_v11 }
0x3188   :  { %3504 = vmatmul.mubr.msk.f32.vlgmr.msra.gmra.mrb[22].mxu1 %vm71_vm1, %v4126_v61 }
0x3189   :  { %3735 = vmatpush3.bf16.msra.mxu1 %v4400_v19  ;;  %3525 = vmatprep.mubr.msk.f32.mxu1 %vm3999_vm0, %v4000_v14 }
0x318a   :  { %3736 = vmatprep.subr.bf16.mxu1 %v3998_v11 }
0x318d   :  { %3738 = vmatpush3.bf16.msra.mxu1 %v4410_v25 }
0x318e   :  { %3745 = vmatprep.subr.bf16.mxu1 %v3998_v11 }
0x3190   :  { %3526 = vmatmul.mubr.msk.f32.vlgmr.msra.gmra.mrb[24].mxu1 %vm71_vm1, %v4213_v39 }
0x3191   :  { %3747 = vmatpush3.bf16.msra.mxu1 %v4400_v19  ;;  %3547 = vmatprep.mubr.msk.f32.mxu1 %vm3999_vm0, %v4000_v14 }
0x3192   :  { %3748 = vmatprep.subr.bf16.mxu1 %v3998_v11 }
0x3195   :  { %3750 = vmatpush3.bf16.msra.mxu1 %v4410_v25 }
0x3196   :  { %3757 = vmatprep.subr.bf16.mxu1 %v3998_v11 }
0x3198   :  { %3548 = vmatmul.mubr.msk.f32.vlgmr.msra.gmra.mrb[26].mxu1 %vm71_vm1, %v4295_v22  ;;  %v2296_v22 = vunpack.c.0.s8 %v2295_v26 }
0x3199   :  { %3759 = vmatpush3.bf16.msra.mxu1 %v4400_v19  ;;  %3569 = vmatprep.mubr.msk.f32.mxu1 %vm3999_vm0, %v4000_v14 }
0x319a   :  { %3760 = vmatprep.subr.bf16.mxu1 %v3998_v11 }
0x319d   :  { %3762 = vmatpush3.bf16.msra.mxu1 %v4410_v25 }
0x31a0   :  { %3570 = vmatmul.mubr.msk.f32.vlgmr.msra.gmra.mrb[28].mxu1 %vm71_vm1, %v1943_v41 }
0x3253   :  { %v2107_v61 = vpop.f32.mrb[20].mxu1 }
0x3254   :  { %v2108_v39 = vadd.f32 %v4365_v37, %v2107_v61  ;;  %v3483_v27 = vpop.f32.mrb[21].mxu1  ;;  %v4451_v37 = vsub.s32 %v2296_v22, %v2298_v31 }
0x3256   :  { %3955 = vtanh.f32 %v2108_v39  ;;  %v3076_v53 = vmul.f32 -1.442695, %v2108_v39 }
0x3258   :  { %3957 = vpow2.f32 %v3076_v53 }
0x325b   :  { %v2288_v33 = vpop.f32.mrb[22].mxu1 }
0x325c   :  { %v2289_v38 = vadd.f32 %v4445_v32, %v2288_v33  ;;  %v3505_v55 = vpop.f32.mrb[23].mxu1 }
0x325e   :  { %v4453_v40 = vadd.f32 %v2289_v38, %v33_v35 }
0x3260   :  { %v3956_v42 = vpop.eup %3955  ;;  %v2300_v43 = vrot.slane %v4453_v40, %v4451_v37 }
0x3261   :  { %2119 = vrot.lane.b32.xlu0 %v3956_v42, %s3997_s11 }
0x3262   :  { %v2301_v57 = vcombine.high %v2300_v43, %v2300_v43  ;;  %v2308_v45 = vrot.slane %v2300_v43, %v4451_v37  ;;  %v3958_v54 = vpop.eup %3957 }
0x3263   :  { %v2485_v44 = vpop.f32.mrb[24].mxu1  ;;  %v2114_v56 = vadd.f32 1.0, %v3958_v54 }
0x3264   :  { %v2315_v46 = vrot.slane %v2301_v57, %v4451_v37  ;;  %2319 = vst.msk [vmem:[#allocation2] sm:$0x1] %vm2318_vm2, %v2308_v45  ;;  %v3527_v47 = vpop.f32.mrb[25].mxu1  ;;  %v2486_v4 = vadd.f32 %v4445_v32, %v2485_v44 }
0x3265   :  { %3959 = vrcp.f32 %v2114_v56 }
0x3266   :  { %2320 = vst.msk [vmem:[#allocation2 + $0x8] sm:$0x1] %vm2318_vm2, %v2315_v46 }
0x326b   :  { %v4462_v48 = vpop.f32.mrb[26].mxu1 }
0x326c   :  { %v3549_v50 = vpop.f32.mrb[27].mxu1  ;;  %v2682_v62 = vadd.f32 %v4445_v32, %v4462_v48 }
0x326f   :  { %v3960_v12 = vpop.eup %3959 }
0x3273   :  { %v4464_v51 = vpop.f32.mrb[28].mxu1 }
0x3274   :  { %v3571_v52 = vpop.f32.mrb[29].mxu1  ;;  %v2878_v31 = vadd.f32 %v4445_v32, %v4464_v51 }
0x32d3   :  { %v2120_v58 = vpop.permute.xlu0 %2119 }
0x32d4   :  { %v2122_v20 = vmul.f32 %v3960_v12, %v2120_v58 }
0x32d6   :  { %3961 = vtanh.f32 %v2122_v20 }
0x32e0   :  { %v3962_v59 = vpop.eup %3961 }
0x32e1   :  { %2125 = vrot.lane.b32.xlu1 %v3962_v59, %s4001_s20 }
0x3353   :  { %v2126_v60 = vpop.permute.xlu1 %2125 }
0x3354   :  { %v2128_v15 = vmul.f32 %v3960_v12, %v2126_v60 }
0x3356   :  { %2130 = vrot.lane.b32.xlu0 %v2128_v15, %s4002_s21 }
0x33c8   :  { %v2131_v63 = vpop.permute.xlu0 %2130 }
0x33c9   :  { %3493 = vmatmul.mubr.msk.f32.vlgmr.msra.gmra.mrb[22].mxu0 %vm71_vm1, %v2131_v63 }
0x33ca   :  { %3729 = vmatpush3.bf16.msra.mxu0 %v4400_v19  ;;  %3514 = vmatprep.mubr.msk.f32.mxu0 %vm3999_vm0, %v4000_v14 }
0x33cb   :  { %3730 = vmatprep.subr.bf16.mxu0 %v3998_v11 }
0x33ce   :  { %3732 = vmatpush3.bf16.msra.mxu0 %v4410_v25 }
0x33cf   :  { %3739 = vmatprep.subr.bf16.mxu0 %v3998_v11 }
0x33d1   :  { %3515 = vmatmul.mubr.msk.f32.vlgmr.msra.gmra.mrb[24].mxu0 %vm71_vm1, %v4172_v49 }
0x33d2   :  { %3741 = vmatpush3.bf16.msra.mxu0 %v4400_v19  ;;  %3536 = vmatprep.mubr.msk.f32.mxu0 %vm3999_vm0, %v4000_v14 }
0x33d3   :  { %3742 = vmatprep.subr.bf16.mxu0 %v3998_v11 }
0x33d6   :  { %3744 = vmatpush3.bf16.msra.mxu0 %v4410_v25 }
0x33d7   :  { %3751 = vmatprep.subr.bf16.mxu0 %v3998_v11 }
0x33d9   :  { %3537 = vmatmul.mubr.msk.f32.vlgmr.msra.gmra.mrb[26].mxu0 %vm71_vm1, %v4254_v29  ;;  %v3972_v29 = vld [vmem:[%s4562_s0 + $0x50] ss:$0 sm:$0xff]  ;;  %s4004_s0 = smov [#allocation2]  }
0x33da   :  { %3753 = vmatpush3.bf16.msra.mxu0 %v4400_v19  ;;  %3558 = vmatprep.mubr.msk.f32.mxu0 %vm3999_vm0, %v4000_v14 }
0x33db   :  { %3754 = vmatprep.subr.bf16.mxu0 %v3998_v11 }
0x33de   :  { %3756 = vmatpush3.bf16.msra.mxu0 %v4410_v25 }
0x33df   :  { %3763 = vmatprep.subr.bf16.mxu0 %v3998_v11 }
0x33e1   :  { %3559 = vmatmul.mubr.msk.f32.vlgmr.msra.gmra.mrb[28].mxu0 %vm71_vm1, %v4336_v0 }
0x33e2   :  { %3765 = vmatpush3.bf16.msra.mxu0 %v4400_v19  ;;  %3580 = vmatprep.mubr.msk.f32.mxu0 %vm3999_vm0, %v4000_v14 }
0x33e3   :  { %3766 = vmatprep.subr.bf16.mxu0 %v3998_v11 }
0x33e6   :  { %3768 = vmatpush3.bf16.msra.mxu0 %v4410_v25 }
0x349c   :  { %v2200_v49 = vpop.f32.mrb[22].mxu0 }
0x349d   :  { %v2201_v1 = vadd.f32 %v3972_v29, %v2200_v49  ;;  %v3494_v41 = vpop.f32.mrb[23].mxu0 }
0x349f   :  { %3963 = vtanh.f32 %v2201_v1  ;;  %v3078_v47 = vmul.f32 -1.442695, %v2201_v1 }
0x34a1   :  { %3965 = vpow2.f32 %v3078_v47 }
0x34a4   :  { %v2387_v2 = vpop.f32.mrb[24].mxu0 }
0x34a5   :  { %v2388_v0 = vadd.f32 %v4445_v32, %v2387_v2  ;;  %v3516_v3 = vpop.f32.mrb[25].mxu0 }
0x34a7   :  { %v2391_v14 = vadd.f32 %v2388_v0, %v4453_v40 }
0x34a9   :  { %v3964_v5 = vpop.eup %3963  ;;  %v2399_v11 = vrot.slane %v2391_v14, %v4451_v37  ;;  %v2489_v6 = vadd.f32 %v2486_v4, %v2391_v14 }
0x34aa   :  { %2212 = vrot.lane.b32.xlu1 %v3964_v5, %s3997_s11  ;;  %s3017_s11 = sshll.u32 %s4004_s0, 4  ;;  %s3018_s11 = int_to_ptr.vmem [resolvable:$true] %s3017_s11 }
0x34ab   :  { %v2400_v34 = vcombine.high %v2399_v11, %v2399_v11  ;;  %v2407_v7 = vrot.slane %v2399_v11, %v4451_v37  ;;  %v2497_v8 = vrot.slane %v2489_v6, %v4451_v37  ;;  %v3966_v48 = vpop.eup %3965  ;;  %p3978_p1 = scmp.lt.s32.totalorder %s3018_s11, %s3018_s11 }
0x34ac   :  { %v2583_v9 = vpop.f32.mrb[26].mxu0  ;;  %v2207_v50 = vadd.f32 1.0, %v3966_v48 }
0x34ad   :  { %v2414_v10 = vrot.slane %v2400_v34, %v4451_v37  ;;  %2417 = vst.msk [vmem:[#allocation2 + $0x1] sm:$0x1] %vm2318_vm2, %v2407_v7  ;;  %v2498_v36 = vcombine.high %v2497_v8, %v2497_v8  ;;  %v2505_v13 = vrot.slane %v2497_v8, %v4451_v37  ;;  %v2584_v16 = vadd.f32 %v4445_v32, %v2583_v9  ;;  %v3538_v17 = vpop.f32.mrb[27].mxu0 }
0x34ae   :  { %3967 = vrcp.f32 %v2207_v50 }
0x34af   :  { %2418 = vst.msk [vmem:[#allocation2 + $0x9] sm:$0x1] %vm2318_vm2, %v2414_v10  ;;  %v2512_v18 = vrot.slane %v2498_v36, %v4451_v37  ;;  %2515 = vst.msk [vmem:[#allocation2 + $0x2] sm:$0x1] %vm2318_vm2, %v2505_v13  ;;  %v2587_v19 = vadd.f32 %v2584_v16, %v2489_v6 }
0x34b1   :  { %2516 = vst.msk [vmem:[#allocation2 + $0xa] sm:$0x1] %vm2318_vm2, %v2512_v18  ;;  %v2595_v21 = vrot.slane %v2587_v19, %v4451_v37  ;;  %v2685_v23 = vadd.f32 %v2682_v62, %v2587_v19 }
0x34b3   :  { %v2596_v24 = vcombine.high %v2595_v21, %v2595_v21  ;;  %v2603_v25 = vrot.slane %v2595_v21, %v4451_v37  ;;  %v2693_v61 = vrot.slane %v2685_v23, %v4451_v37 }
0x34b4   :  { %v2779_v39 = vpop.f32.mrb[28].mxu0 }
0x34b5   :  { %v2610_v27 = vrot.slane %v2596_v24, %v4451_v37  ;;  %2613 = vst.msk [vmem:[#allocation2 + $0x3] sm:$0x1] %vm2318_vm2, %v2603_v25  ;;  %v2694_v28 = vcombine.high %v2693_v61, %v2693_v61  ;;  %v2701_v26 = vrot.slane %v2693_v61, %v4451_v37  ;;  %v2780_v30 = vadd.f32 %v4445_v32, %v2779_v39  ;;  %v3560_v22 = vpop.f32.mrb[29].mxu0 }
0x34b7   :  { %2614 = vst.msk [vmem:[#allocation2 + $0xb] sm:$0x1] %vm2318_vm2, %v2610_v27  ;;  %v2708_v35 = vrot.slane %v2694_v28, %v4451_v37  ;;  %2711 = vst.msk [vmem:[#allocation2 + $0x4] sm:$0x1] %vm2318_vm2, %v2701_v26  ;;  %v2783_v33 = vadd.f32 %v2780_v30, %v2685_v23 }
0x34b8   :  { %v3968_v51 = vpop.eup %3967 }
0x34b9   :  { %2712 = vst.msk [vmem:[#allocation2 + $0xc] sm:$0x1] %vm2318_vm2, %v2708_v35  ;;  %v2791_v38 = vrot.slane %v2783_v33, %v4451_v37  ;;  %v2881_v55 = vadd.f32 %v2878_v31, %v2783_v33 }
0x34bb   :  { %v2792_v40 = vcombine.high %v2791_v38, %v2791_v38  ;;  %v2799_v42 = vrot.slane %v2791_v38, %v4451_v37  ;;  %v2889_v43 = vrot.slane %v2881_v55, %v4451_v37 }
0x34bd   :  { %v2806_v57 = vrot.slane %v2792_v40, %v4451_v37  ;;  %2809 = vst.msk [vmem:[#allocation2 + $0x5] sm:$0x1] %vm2318_vm2, %v2799_v42  ;;  %v2890_v45 = vcombine.high %v2889_v43, %v2889_v43  ;;  %v2897_v44 = vrot.slane %v2889_v43, %v4451_v37 }
0x34bf   :  { %2810 = vst.msk [vmem:[#allocation2 + $0xd] sm:$0x1] %vm2318_vm2, %v2806_v57  ;;  %v2904_v46 = vrot.slane %v2890_v45, %v4451_v37  ;;  %2907 = vst.msk [vmem:[#allocation2 + $0x6] sm:$0x1] %vm2318_vm2, %v2897_v44 }
0x34c1   :  { %2908 = vst.msk [vmem:[#allocation2 + $0xe] sm:$0x1] %vm2318_vm2, %v2904_v46 }
0x351c   :  { %v2213_v52 = vpop.permute.xlu1 %2212 }
0x351d   :  { %v2215_v53 = vmul.f32 %v3968_v51, %v2213_v52 }
0x351f   :  { %3969 = vtanh.f32 %v2215_v53 }
0x3529   :  { %v3970_v54 = vpop.eup %3969 }
0x352a   :  { %2218 = vrot.lane.b32.xlu0 %v3970_v54, %s4001_s20  ;;  %s3973_s20 = scalar_lea.vmem %s3018_s11, 256 }
0x352b   :  { %p3974_p0 = scmp.ne.s32.totalorder %s3018_s11, %s3973_s20  ;;  %p3979_p2 = scmp.lt.s32.totalorder %s3973_s20, %s3973_s20 }
0x352d   :  { %p3980_p3 = por %p3979_p2, %p3978_p1 }
0x352f   :  { %p3981_p4 = pnand %p3980_p3, %p3974_p0 }
0x359c   :  { %v2219_v56 = vpop.permute.xlu0 %2218 }
0x359d   :  { %v2221_v12 = vmul.f32 %v3968_v51, %v2219_v56 }
0x359f   :  { %2910 = vrot.lane.b32.xlu1 %v2221_v12, %s4002_s21 }
0x3611   :  { %v2911_v58 = vpop.permute.xlu1 %2910 }
0x3612   :  { %3581 = vmatmul.mubr.msk.f32.vlgmr.msra.gmra.mrb[30].mxu0 %vm71_vm1, %v2911_v58 }
0x36e5   :  { %v2980_v20 = vpop.f32.mrb[30].mxu0 }
0x36e6   :  { %v2981_v59 = vadd.f32 %v4445_v32, %v2980_v20  ;;  %v3582_v60 = vpop.f32.mrb[31].mxu0 }
0x36e8   :  { %v2984_v15 = vadd.f32 %v2981_v59, %v2881_v55 }
0x36ea   :  { %v2992_v63 = vrot.slane %v2984_v15, %v4451_v37 }
0x36ec   :  { %v2993_v49 = vcombine.high %v2992_v63, %v2992_v63  ;;  %v3000_v29 = vrot.slane %v2992_v63, %v4451_v37 }
0x36ee   :  { %v3007_v1 = vrot.slane %v2993_v49, %v4451_v37  ;;  %3010 = vst.msk [vmem:[#allocation2 + $0x7] sm:$0x1] %vm2318_vm2, %v3000_v29 }
0x36f0   :  { %3011 = vst.msk [vmem:[#allocation2 + $0xf] sm:$0x1] %vm2318_vm2, %v3007_v1 }
0x36f1   :  { %3984 = shalt.err (!%p3981_p4)
}
0x36f2   :  { %s3985_s7 = scalar_lea.hbm %s4564_s2, 256 }
0x36f3   :  { %p3986_p5 = scmp.ne.s32.totalorder %s4564_s2, %s3985_s7  ;;  %p3989_p6 = scmp.lt.u32.totalorder %s3985_s7, %s4564_s2 }
0x36f5   :  { %p3991_p7 = pnand %p3989_p6, %p3986_p5 }
0x36f7   :  { %3994 = shalt.err (!%p3991_p7)
}
0x36f8   :  { %s4005_s13 = smov 128   ;;  %s4006_s14 = smov 8  }
0x36f9   :  { %3023 = dma.vmem_to_hbm [thread:$0]  %s3018_s11, 256, %s4564_s2, [#allocation3], %s4005_s13, %s4005_s13, %s4006_s14  }
0x36fa   :  { %3995 = dma.done.wait [#allocation3], 256  }
0x36fb   :  { %3996 = vsyncadd [#allocation3], 4294967040 }
0x36fc   :  { %3027 = vsyncpa [#allocation3], 1 }

</bundles_post_ra>
